<compile_context>
chip_gen: v7x
topology: tpu7x:2x2x1
jax: 0.10.0
libtpu: 0.0.40
codegen_flags: <defaults>
</compile_context>

<pallas_src>
import functools
import math

import jax
import jax.numpy as jnp
from jax.experimental import pallas as pl
from jax.experimental.pallas import tpu as pltpu


def _round_up(x: int, m: int) -> int:
    return ((x + m - 1) // m) * m


def _pick_tile(dim: int, max_tile: int, mult: int) -> int:
    """Largest tile <= max_tile (multiple of `mult`) minimizing padding of `dim`."""
    dim_r = _round_up(dim, mult)
    if dim_r <= max_tile:
        return dim_r
    best_t, best_pad = None, None
    for t in range(mult, max_tile + 1, mult):
        pad = _round_up(dim, t) - dim
        if best_t is None or pad < best_pad or (pad == best_pad and t > best_t):
            best_t, best_pad = t, pad
    return best_t


def _lora_kernel_single_k(x_ref, wt_ref, b_ref, z_ref, bt_ref, o_ref, *,
                          compute_dtype):
    # Grid = (M tiles, N tiles, 1).  Whole K fits in one tile -> no accumulator.
    x = x_ref[...].astype(compute_dtype)
    acc = jnp.dot(x, wt_ref[...], preferred_element_type=jnp.float32)
    lora = jnp.dot(z_ref[...], bt_ref[...], preferred_element_type=jnp.float32)
    o_ref[...] = (acc + b_ref[...] + lora).astype(o_ref.dtype)


def _lora_kernel_multi_k(x_ref, wt_ref, b_ref, z_ref, bt_ref, o_ref, acc_ref, *,
                         compute_dtype):
    # Grid = (M tiles, N tiles, K tiles); K is the innermost reduction axis.
    k = pl.program_id(2)
    nk = pl.num_programs(2)

    @pl.when(k == 0)
    def _():
        acc_ref[...] = jnp.zeros_like(acc_ref)

    x = x_ref[...].astype(compute_dtype)
    acc_ref[...] += jnp.dot(x, wt_ref[...], preferred_element_type=jnp.float32)

    @pl.when(k == nk - 1)
    def _():
        lora = jnp.dot(z_ref[...], bt_ref[...], preferred_element_type=jnp.float32)
        o_ref[...] = (acc_ref[...] + b_ref[...] + lora).astype(o_ref.dtype)


def prepare_lora_params(weight, bias, lora_A, lora_B, *,
                        compute_dtype=jnp.bfloat16, max_tn=512, max_tk=2048):
    """One-time parameter prep (do NOT call per forward pass).

    Transposes, casts to the MXU compute dtype, and zero-pads so the per-call
    path never re-lays-out the weights:
        weight (out, in) -> wt (K_p, N_p) = W^T padded, compute_dtype
        lora_A (r, in)   -> a_t (in, r)   = A^T, compute_dtype (used by the
                                            tiny hoisted z matmul)
        lora_B (out, r)  -> bt (r_p, N_p) = B^T padded, compute_dtype
        bias   (out,)    -> b2 (1, N_p)   f32
    """
    out_f, in_f = weight.shape
    r = lora_A.shape[0] if lora_A is not None else 0

    tn = _pick_tile(out_f, max_tn, 128)      # lane-dense output tiles
    tk = _pick_tile(in_f, max_tk, 128)       # full K in one tile when it fits
    n_p = _round_up(out_f, tn)
    k_p = _round_up(in_f, tk)
    r_p = _round_up(max(r, 1), 16)           # bf16 sublane multiple

    wt = jnp.zeros((k_p, n_p), compute_dtype).at[:in_f, :out_f].set(
        weight.T.astype(compute_dtype))
    bt = jnp.zeros((r_p, n_p), compute_dtype)
    if r > 0:
        bt = bt.at[:r, :out_f].set(lora_B.T.astype(compute_dtype))
        a_t = lora_A.T.astype(compute_dtype)            # (in_f, r)
    else:
        a_t = None
    if bias is None:
        b2 = jnp.zeros((1, n_p), jnp.float32)
    else:
        b2 = jnp.zeros((1, n_p), jnp.float32).at[0, :out_f].set(
            bias.astype(jnp.float32))

    # TODO(synk): a merged-weight mode (W + scaling * B @ A baked into wt) for
    # single-adapter inference would reduce this to a plain GEMM+bias kernel.
    return dict(wt=wt, a_t=a_t, bt=bt, b2=b2,
                out_f=out_f, in_f=in_f, r=r, r_p=r_p, tn=tn, tk=tk,
                compute_dtype=compute_dtype)


def lora_linear(x, params, scaling, *, max_tm=512, out_dtype=None):
    """x: (..., in_features). params: output of prepare_lora_params."""
    out_f, in_f, r, r_p = params["out_f"], params["in_f"], params["r"], params["r_p"]
    tn, tk = params["tn"], params["tk"]
    wt, a_t, bt, b2 = params["wt"], params["a_t"], params["bt"], params["b2"]
    compute_dtype = params["compute_dtype"]
    k_p, n_p = wt.shape
    out_dtype = x.dtype if out_dtype is None else out_dtype

    lead = x.shape[:-1]
    M = math.prod(lead) if lead else 1
    x2 = x.reshape(M, in_f)

    tm = _pick_tile(M, max_tm, 8)
    m_p = _round_up(M, tm)
    grid = (m_p // tm, n_p // tn, k_p // tk)
    nk = grid[2]

    # x stays in its original dtype (cast to bf16 inside the kernel); only pad
    # when the tile grid actually requires it (no unconditional copy).
    if m_p != M or k_p != in_f:
        xp = jnp.zeros((m_p, k_p), x2.dtype).at[:M, :in_f].set(x2)
    else:
        xp = x2

    # Hoisted rank-r intermediate: z = (x @ A^T) * scaling, tiny (M, r) matmul.
    # Scaling is applied here (outside the kernel), so it never forces a
    # kernel recompile and is applied to the rank-r tensor, not (M, N).
    if r > 0:
        z = jnp.dot(x2.astype(compute_dtype), a_t,
                    preferred_element_type=jnp.float32) * scaling
        zp = jnp.zeros((m_p, r_p), compute_dtype).at[:M, :r].set(
            z.astype(compute_dtype))
    else:
        zp = jnp.zeros((m_p, r_p), compute_dtype)

    # Advisory cost estimate for the XLA scheduler (kernel work only).
    x_item = jnp.dtype(x.dtype).itemsize
    c_item = jnp.dtype(compute_dtype).itemsize
    o_item = jnp.dtype(out_dtype).itemsize
    cost = pl.CostEstimate(
        flops=2 * M * out_f * in_f + 2 * M * r * out_f,
        transcendentals=0,
        bytes_accessed=(xp.size * x_item + wt.size * c_item + b2.size * 4
                        + zp.size * c_item + bt.size * c_item
                        + m_p * n_p * o_item),
    )

    # VMEM budget: double-buffered in/out tiles (+ accumulator scratch if any),
    # sized to ~1.5x demand with a small headroom, capped at 48 MiB (v7x-safe).
    tile_bytes = 2 * (tm * tk * x_item + tk * tn * c_item + tn * 4
                      + tm * r_p * c_item + r_p * tn * c_item
                      + tm * tn * o_item)
    scratch_bytes = tm * tn * 4 if nk > 1 else 0
    need = tile_bytes + scratch_bytes
    vmem_limit = int(min(48 * 1024 * 1024, need + need // 2 + (2 << 20)))

    if nk == 1:
        kernel = functools.partial(_lora_kernel_single_k,
                                   compute_dtype=compute_dtype)
        scratch_shapes = []
    else:
        kernel = functools.partial(_lora_kernel_multi_k,
                                   compute_dtype=compute_dtype)
        scratch_shapes = [pltpu.VMEM((tm, tn), jnp.float32)]

    out = pl.pallas_call(
        kernel,
        out_shape=jax.ShapeDtypeStruct((m_p, n_p), out_dtype),
        grid=grid,
        in_specs=[
            pl.BlockSpec((tm, tk), lambda i, j, k: (i, k)),    # x
            pl.BlockSpec((tk, tn), lambda i, j, k: (k, j)),    # W^T
            pl.BlockSpec((1, tn), lambda i, j, k: (0, j)),     # bias
            pl.BlockSpec((tm, r_p), lambda i, j, k: (i, 0)),   # z = x A^T * s
            pl.BlockSpec((r_p, tn), lambda i, j, k: (0, j)),   # B^T
        ],
        out_specs=pl.BlockSpec((tm, tn), lambda i, j, k: (i, j)),
        scratch_shapes=scratch_shapes,
        compiler_params=pltpu.CompilerParams(
            # z is now a pure input (no cross-j scratch), so both M and N axes
            # are safe to shard across TensorCores (v7x megacore).
            dimension_semantics=("parallel", "parallel", "arbitrary"),
            vmem_limit_bytes=vmem_limit,
        ),
        cost_estimate=cost,
    )(xp, wt, b2, zp, bt)

    return out[:M, :out_f].reshape(*lead, out_f)


if __name__ == "__main__":
    # Small synthetic config (non-power-of-two N, multiple row tiles in the
    # second run, both nk==1 and nk>1 kernel paths exercised).
    in_features = 512
    out_features = 384
    r = 8
    lora_alpha = 16
    scaling = lora_alpha / r          # = 2.0
    batch, seq = 2, 96                # M = 192

    key = jax.random.PRNGKey(0)
    k_x, k_w, k_b, k_a, k_bb = jax.random.split(key, 5)

    # nn.Linear default init: kaiming_uniform(a=sqrt(5)) -> U(-1/sqrt(in), 1/sqrt(in))
    bound = 1.0 / math.sqrt(in_features)
    weight = jax.random.uniform(
        k_w, (out_features, in_features), jnp.float32, -bound, bound)
    bias = jax.random.uniform(k_b, (out_features,), jnp.float32, -bound, bound)
    lora_A = jax.random.uniform(k_a, (r, in_features), jnp.float32, -bound, bound)
    # NOTE: the PyTorch module zero-inits lora_B; we use small nonzero values so
    # the LoRA branch is numerically exercised (forward semantics unchanged).
    lora_B = 0.1 * jax.random.normal(k_bb, (out_features, r), jnp.float32)

    x = jax.random.normal(k_x, (batch, seq, in_features), jnp.float32)

    # Pure-JAX f32 reference (kernel uses bf16 operands with f32 accumulation).
    ref = x @ weight.T + bias + (x @ lora_A.T) @ lora_B.T * scaling

    # TODO(synk): lora_dropout > 0 (training-time mask on the LoRA branch input)
    # is not implemented; module default p=0.0 -> identity is what runs here.

    # Path 1: K fits in a single tile -> single-K kernel, no accumulator scratch.
    params1 = prepare_lora_params(weight, bias, lora_A, lora_B)
    out1 = jax.block_until_ready(lora_linear(x, params1, scaling))

    # Path 2: force a multi-K-tile reduction + M/N tiling (accumulator path).
    params2 = prepare_lora_params(weight, bias, lora_A, lora_B,
                                  max_tk=256, max_tn=256)
    out2 = jax.block_until_ready(lora_linear(x, params2, scaling, max_tm=128))

    for out in (out1, out2):
        assert out.shape == (batch, seq, out_features)
        assert jnp.allclose(out, ref, atol=2e-2, rtol=2e-2), "mismatch vs reference"

    print("KERNEL_OK")
</pallas_src>

<mosaic_0001>
module attributes {stable_mosaic.version = 11 : i64} {
  func.func @_lora_kernel_single_k(%arg0: i32, %arg1: i32, %arg2: i32, %arg3: memref<192x512xf32, #tpu.memory_space<vmem>>, %arg4: memref<512x384xbf16, #tpu.memory_space<vmem>>, %arg5: memref<1x384xf32, #tpu.memory_space<vmem>>, %arg6: memref<192x16xbf16, #tpu.memory_space<vmem>>, %arg7: memref<16x384xbf16, #tpu.memory_space<vmem>>, %arg8: memref<192x384xf32, #tpu.memory_space<vmem>>) attributes {dimension_semantics = [#tpu.dimension_semantics<parallel>, #tpu.dimension_semantics<parallel>, #tpu.dimension_semantics<arbitrary>], iteration_bounds = array<i64: 1, 1, 1>, scalar_prefetch = 0 : i64, scratch_operands = 0 : i64, tpu.core_type = #tpu.core_type<tc>, window_params = [{transform_indices = @transform_0, window_bounds = array<i64: 192, 512>}, {transform_indices = @transform_1, window_bounds = array<i64: 512, 384>}, {transform_indices = @transform_2, window_bounds = array<i64: 1, 384>}, {transform_indices = @transform_3, window_bounds = array<i64: 192, 16>}, {transform_indices = @transform_4, window_bounds = array<i64: 16, 384>}, {transform_indices = @transform_5, window_bounds = array<i64: 192, 384>}]} {
    %c0 = arith.constant 0 : index
    %c0_0 = arith.constant 0 : index
    %0 = vector.load %arg3[%c0, %c0_0] : memref<192x512xf32, #tpu.memory_space<vmem>>, vector<192x512xf32>
    %1 = arith.truncf %0 : vector<192x512xf32> to vector<192x512xbf16>
    %c0_1 = arith.constant 0 : index
    %c0_2 = arith.constant 0 : index
    %2 = vector.load %arg4[%c0_1, %c0_2] : memref<512x384xbf16, #tpu.memory_space<vmem>>, vector<512x384xbf16>
    %cst = arith.constant dense<0.000000e+00> : vector<192x384xf32>
    %3 = tpu.matmul %1, %2, %cst {dimension_numbers = #tpu.dot_dimension_numbers<[1], [0], [0], [1], [0, 0, 1, 1], [], []>} : vector<192x512xbf16>, vector<512x384xbf16>, vector<192x384xf32> -> vector<192x384xf32>
    %c0_3 = arith.constant 0 : index
    %c0_4 = arith.constant 0 : index
    %4 = vector.load %arg6[%c0_3, %c0_4] : memref<192x16xbf16, #tpu.memory_space<vmem>>, vector<192x16xbf16>
    %c0_5 = arith.constant 0 : index
    %c0_6 = arith.constant 0 : index
    %5 = vector.load %arg7[%c0_5, %c0_6] : memref<16x384xbf16, #tpu.memory_space<vmem>>, vector<16x384xbf16>
    %cst_7 = arith.constant dense<0.000000e+00> : vector<192x384xf32>
    %6 = tpu.matmul %4, %5, %cst_7 {dimension_numbers = #tpu.dot_dimension_numbers<[1], [0], [0], [1], [0, 0, 1, 1], [], []>} : vector<192x16xbf16>, vector<16x384xbf16>, vector<192x384xf32> -> vector<192x384xf32>
    %c0_8 = arith.constant 0 : index
    %c0_9 = arith.constant 0 : index
    %7 = vector.load %arg5[%c0_8, %c0_9] : memref<1x384xf32, #tpu.memory_space<vmem>>, vector<1x384xf32>
    %8 = vector.broadcast %7 : vector<1x384xf32> to vector<192x384xf32>
    %9 = arith.addf %3, %8 : vector<192x384xf32>
    %10 = arith.addf %9, %6 : vector<192x384xf32>
    %c0_10 = arith.constant 0 : index
    %c0_11 = arith.constant 0 : index
    %11 = vector.load %arg8[%c0_10, %c0_11] : memref<192x384xf32, #tpu.memory_space<vmem>>, vector<192x384xf32>
    tpu.vector_store %arg8[%c0_10, %c0_11], %10 {strides = array<i32>} : memref<192x384xf32, #tpu.memory_space<vmem>>, vector<192x384xf32>,
    return
  }
  func.func @transform_0(%arg0: i32, %arg1: i32, %arg2: i32) -> (i32, i32) {
    %c0_i32 = arith.constant 0 : i32
    return %arg0, %arg2 : i32, i32
  }
  func.func @transform_1(%arg0: i32, %arg1: i32, %arg2: i32) -> (i32, i32) {
    %c0_i32 = arith.constant 0 : i32
    return %arg2, %arg1 : i32, i32
  }
  func.func @transform_2(%arg0: i32, %arg1: i32, %arg2: i32) -> (i32, i32) {
    %c0_i32 = arith.constant 0 : i32
    %c0_i32_0 = arith.constant 0 : i32
    return %c0_i32, %arg1 : i32, i32
  }
  func.func @transform_3(%arg0: i32, %arg1: i32, %arg2: i32) -> (i32, i32) {
    %c0_i32 = arith.constant 0 : i32
    %c0_i32_0 = arith.constant 0 : i32
    return %arg0, %c0_i32 : i32, i32
  }
  func.func @transform_4(%arg0: i32, %arg1: i32, %arg2: i32) -> (i32, i32) {
    %c0_i32 = arith.constant 0 : i32
    %c0_i32_0 = arith.constant 0 : i32
    return %c0_i32, %arg1 : i32, i32
  }
  func.func @transform_5(%arg0: i32, %arg1: i32, %arg2: i32) -> (i32, i32) {
    %c0_i32 = arith.constant 0 : i32
    return %arg0, %arg1 : i32, i32
  }
}

</mosaic_0001>

<bundles_post_ra>
// kernel: tpu_custom_call.1
= control target key start
LH: loop header
LB: loop body
LE: loop exit
PB: predicated region body
PF: predicated region fallthrough
CT: control target
= control target key end

     0   :  { %10 = vsyncpa [#allocation3], 0  ;;  %s3152_s0 = inlined_call_operand.hbm [shape: f32[192,512], index: 0, kind: input, shape index: {}]   ;;  %s3153_s1 = inlined_call_operand.hbm [shape: bf16[512,384], index: 1, kind: input, shape index: {}]   ;;  %s3154_s2 = inlined_call_operand.vmem [shape: f32[1,384], index: 2, kind: input, shape index: {}]   ;;  %s3155_s3 = inlined_call_operand.vmem [shape: bf16[192,16], index: 3, kind: input, shape index: {}]   ;;  %s3156_s4 = inlined_call_operand.vmem [shape: bf16[16,384], index: 4, kind: input, shape index: {}]   ;;  %s3157_s5 = inlined_call_operand.hbm [shape: f32[192,384], index: 5, kind: output, shape index: {}]  }
   0x1   :  { %11 = vsyncpa [#allocation6], 0 }
   0x2   :  { %12 = vsyncpa [#allocation4], 0  ;;  %s2722_s18 = smov [#allocation2]   ;;  %s2650_s22 = scalar_lea.hbm %s3152_s0, 12288 }
   0x3   :  { %s18_s19 = sshll.u32 %s2722_s18, 4  ;;  %p2651_p0 = scmp.ne.s32.totalorder %s3152_s0, %s2650_s22  ;;  %s19_s19 = int_to_ptr.vmem [resolvable:$true] %s18_s19 }
   0x4   :  { %p2654_p1 = scmp.lt.u32.totalorder %s2650_s22, %s3152_s0 }
   0x6   :  { %p2656_p2 = pnand %p2654_p1, %p2651_p0 }
   0x8   :  { %2659 = shalt.err (!%p2656_p2)
}
   0x9   :  { %s2660_s27 = scalar_lea.vmem %s19_s19, 12288  ;;  %p2665_p4 = scmp.lt.s32.totalorder %s19_s19, %s19_s19 }
   0xa   :  { %p2661_p3 = scmp.ne.s32.totalorder %s19_s19, %s2660_s27  ;;  %p2666_p5 = scmp.lt.s32.totalorder %s2660_s27, %s2660_s27 }
   0xc   :  { %p2667_p6 = por %p2666_p5, %p2665_p4 }
   0xe   :  { %p2668_p7 = pnand %p2667_p6, %p2661_p3 }
  0x10   :  { %2671 = shalt.err (!%p2668_p7)
}
  0x11   :  { %s2723_s28 = smov 512   ;;  %s2724_s29 = smov 32  }
  0x12   :  { %24 = dma.hbm_to_vmem [thread:$0]  %s3152_s0, 12288, %s19_s19, [#allocation3], %s2723_s28, %s2723_s28, %s2724_s29  }
  0x13   :  { %s2725_s7 = smov [#allocation5]   ;;  %s2672_s11 = scalar_lea.hbm %s3153_s1, 12288 }
  0x14   :  { %s30_s8 = sshll.u32 %s2725_s7, 4  ;;  %p2673_p8 = scmp.ne.s32.totalorder %s3153_s1, %s2672_s11  ;;  %s31_s8 = int_to_ptr.vmem [resolvable:$true] %s30_s8 }
  0x15   :  { %p2676_p9 = scmp.lt.u32.totalorder %s2672_s11, %s3153_s1 }
  0x17   :  { %p2678_p10 = pnand %p2676_p9, %p2673_p8 }
  0x19   :  { %2681 = shalt.err (!%p2678_p10)
}
  0x1a   :  { %s2682_s16 = scalar_lea.vmem %s31_s8, 12288  ;;  %p2687_p12 = scmp.lt.s32.totalorder %s31_s8, %s31_s8 }
  0x1b   :  { %p2683_p11 = scmp.ne.s32.totalorder %s31_s8, %s2682_s16  ;;  %p2688_p13 = scmp.lt.s32.totalorder %s2682_s16, %s2682_s16 }
  0x1d   :  { %p2689_p0 = por %p2688_p13, %p2687_p12 }
  0x1f   :  { %p2690_p1 = pnand %p2689_p0, %p2683_p11 }
  0x21   :  { %2693 = shalt.err (!%p2690_p1)
}
  0x22   :  { %s2726_s0 = smov 192   ;;  %s2727_s17 = smov 12  }
  0x23   :  { %36 = dma.hbm_to_vmem [thread:$0]  %s3153_s1, 12288, %s31_s8, [#allocation6], %s2726_s0, %s2726_s0, %s2727_s17  }
  0x24   :  { %2716 = dma.done.wait [#allocation3], 12288  }
  0x25   :  { %2717 = vsyncadd [#allocation3], 4294955008 }
  0x26   :  { %2718 = dma.done.wait [#allocation6], 12288  }
  0x27   :  { %2719 = vsyncadd [#allocation6], 4294955008  ;;  %v2728_v0 = vmov 0   ;;  %v2506_v1 = vld [vmem:[%s3156_s4 + $0x4] ss:$12 sps:$4 sm:$0xff]   ;;  %vm426_vm0 = vcmask 130048  }
  0x28   :  { %495 = vmatprep.mubr.bf16.mxu0 %v2728_v0  ;;  %585 = vmatprep.mubr.bf16.mxu1 %v2728_v0  ;;  %v2508_v2 = vld [vmem:[%s3156_s4] ss:$12 sps:$4 sm:$0xff]   ;;  %v2511_v5 = vld [vmem:[%s3156_s4 + $0x8] ss:$12 sps:$4 sm:$0xff]   ;;  %v2514_v7 = vld [vmem:[#allocation5 + $0x4] ss:$12 sps:$4 sm:$0xff]  }
  0x29   :  { %463 = vmatprep.subr.bf16.mxu0 %v2506_v1  ;;  %2350 = vmatprep.subr.bf16.mxu1 %v2506_v1  ;;  %v2509_v3 = vld [vmem:[%s3155_s3] sm:$0xff]   ;;  %v2800_v4 = vld [vmem:[%s3155_s3 + $0x48] sm:$0xff]   ;;  %v2816_v11 = vld [vmem:[%s3155_s3 + $0x50] sm:$0xff]  }
  0x2a   :  { %464 = vmatpush1.bf16.msra.mxu0 %v2508_v2  ;;  %2351 = vmatpush1.bf16.msra.mxu1 %v2508_v2  ;;  %v2512_v6 = vld [vmem:[#allocation5] ss:$12 sps:$4 sm:$0xff]   ;;  %v2517_v9 = vld [vmem:[#allocation5 + $0x18] ss:$12 sps:$4 sm:$0xff]   ;;  %v2519_v10 = vld [vmem:[#allocation5 + $0x1c] ss:$12 sps:$4 sm:$0xff]  }
  0x2b   :  { %2324 = vmatprep.subr.bf16.mxu1 %v2511_v5  ;;  %1274 = vmatprep.subr.bf16.mxu0 %v2514_v7  ;;  %v2515_v8 = vld [vmem:[%s3155_s3 + $0x8] sm:$0xff]   ;;  %v2522_v12 = vld [vmem:[#allocation5 + $0x34] ss:$12 sps:$4 sm:$0xff]   ;;  %v2520_v13 = vld [vmem:[#allocation5 + $0x30] ss:$12 sps:$4 sm:$0xff]  }
  0x2c   :  { %v2527_v14 = vld [vmem:[#allocation5 + $0x4c] ss:$12 sps:$4 sm:$0xff]   ;;  %v2525_v15 = vld [vmem:[#allocation5 + $0x48] ss:$12 sps:$4 sm:$0xff]   ;;  %v2530_v18 = vld [vmem:[#allocation5 + $0x64] ss:$12 sps:$4 sm:$0xff]  }
  0x2d   :  { %2015 = vmatmul.mubr.msk.bf16.vlgmr.msra.gmra.mrb[0].mxu0 %vm426_vm0, %v2509_v3  ;;  %2024 = vmatmul.mubr.msk.bf16.vlgmr.msra.gmra.mrb[0].mxu1 %vm426_vm0, %v2800_v4  ;;  %v2523_v16 = vld [vmem:[%s3155_s3 + $0x10] sm:$0xff]   ;;  %v2829_v19 = vld [vmem:[%s3155_s3 + $0x58] sm:$0xff]   ;;  %v2528_v20 = vld [vmem:[#allocation5 + $0x60] ss:$12 sps:$4 sm:$0xff]  }
  0x2e   :  { %2325 = vmatpush3.bf16.msra.mxu1 %v2511_v5  ;;  %1275 = vmatpush1.bf16.msra.mxu0 %v2512_v6  ;;  %v2532_v17 = vld [vmem:[#allocation5 + $0xc8] ss:$12 sps:$4 sm:$0xff]   ;;  %v2534_v22 = vld [vmem:[#allocation5 + $0x78] ss:$12 sps:$4 sm:$0xff]   ;;  %v2537_v26 = vld [vmem:[#allocation5 + $0xe0] ss:$12 sps:$4 sm:$0xff]  }
  0x2f   :  { %505 = vmatprep.mubr.bf16.mxu0 %v2728_v0  ;;  %595 = vmatprep.mubr.bf16.mxu1 %v2728_v0  ;;  %v2536_v21 = vld [vmem:[#allocation5 + $0x7c] ss:$12 sps:$4 sm:$0xff]   ;;  %v2540_v23 = vld [vmem:[#allocation5 + $0x94] ss:$12 sps:$4 sm:$0xff]   ;;  %v2545_v28 = vld [vmem:[#allocation5 + $0xac] ss:$12 sps:$4 sm:$0xff]  }
  0x30   :  { %1276 = vmatprep.subr.bf16.mxu0 %v2519_v10  ;;  %2148 = vmatprep.subr.bf16.mxu1 %v2532_v17  ;;  %v2531_v24 = vld [vmem:[%s3155_s3 + $0x18] sm:$0xff]   ;;  %v2533_v25 = vld [vmem:[#allocation5 + $0x8] ss:$12 sps:$4 sm:$0xff]   ;;  %v2541_v29 = vld [vmem:[#allocation5 + $0x20] ss:$12 sps:$4 sm:$0xff]  }
  0x31   :  { %v2538_v27 = vld [vmem:[#allocation5 + $0x90] ss:$12 sps:$4 sm:$0xff]   ;;  %v2546_v30 = vld [vmem:[#allocation5 + $0xf8] ss:$12 sps:$4 sm:$0xff]   ;;  %v2543_v31 = vld [vmem:[#allocation5 + $0xa8] ss:$12 sps:$4 sm:$0xff]  }
  0x32   :  { %1277 = vmatpush1.bf16.msra.mxu0 %v2517_v9  ;;  %v2542_v32 = vld [vmem:[%s3155_s3 + $0x20] sm:$0xff]   ;;  %v2552_v36 = vld [vmem:[#allocation5 + $0x110] ss:$12 sps:$4 sm:$0xff]   ;;  %v2562_v39 = vld [vmem:[#allocation5 + $0x128] ss:$12 sps:$4 sm:$0xff]  }
  0x33   :  { %1278 = vmatprep.subr.bf16.mxu0 %v2522_v12  ;;  %v2547_v33 = vld [vmem:[#allocation5 + $0x38] ss:$12 sps:$4 sm:$0xff]   ;;  %v2549_v34 = vld [vmem:[#allocation5 + $0xc0] ss:$12 sps:$4 sm:$0xff]   ;;  %v2556_v37 = vld [vmem:[#allocation5 + $0xdc] ss:$12 sps:$4 sm:$0xff]  }
  0x34   :  { %v2551_v35 = vld [vmem:[#allocation5 + $0xc4] ss:$12 sps:$4 sm:$0xff]   ;;  %v2548_v41 = vld [vmem:[%s3155_s3 + $0x28] sm:$0xff]   ;;  %v2561_v44 = vld [vmem:[#allocation5 + $0xf4] ss:$12 sps:$4 sm:$0xff]  }
  0x35   :  { %2016 = vmatmul.mubr.msk.bf16.gmra.mrb[4].mxu0 %vm426_vm0, %v2515_v8  ;;  %2025 = vmatmul.mubr.msk.bf16.gmra.mrb[4].mxu1 %vm426_vm0, %v2816_v11  ;;  %v2553_v38 = vld [vmem:[#allocation5 + $0x50] ss:$12 sps:$4 sm:$0xff]   ;;  %v2554_v40 = vld [vmem:[#allocation5 + $0xd8] ss:$12 sps:$4 sm:$0xff]   ;;  %v2563_v45 = vld [vmem:[#allocation5 + $0x68] ss:$12 sps:$4 sm:$0xff]  }
  0x36   :  { %515 = vmatprep.mubr.bf16.mxu0 %v2728_v0  ;;  %605 = vmatprep.mubr.bf16.mxu1 %v2728_v0  ;;  %v2557_v42 = vld [vmem:[%s3155_s3 + $0x30] sm:$0xff]   ;;  %v2567_v46 = vld [vmem:[#allocation5 + $0x140] ss:$12 sps:$4 sm:$0xff]   ;;  %v2576_v50 = vld [vmem:[#allocation5 + $0x158] ss:$12 sps:$4 sm:$0xff]  }
  0x37   :  { %1279 = vmatpush1.bf16.msra.mxu0 %v2520_v13  ;;  %v2559_v43 = vld [vmem:[#allocation5 + $0xf0] ss:$12 sps:$4 sm:$0xff]   ;;  %v2566_v47 = vld [vmem:[#allocation5 + $0x10c] ss:$12 sps:$4 sm:$0xff]   ;;  %v2564_v48 = vld [vmem:[#allocation5 + $0x108] ss:$12 sps:$4 sm:$0xff]  }
  0x38   :  { %1280 = vmatprep.subr.bf16.mxu0 %v2527_v14  ;;  %v2569_v49 = vld [vmem:[#allocation5 + $0x80] ss:$12 sps:$4 sm:$0xff]   ;;  %v2558_v51 = vld [vmem:[%s3155_s3 + $0x38] sm:$0xff]   ;;  %v2572_v54 = vld [vmem:[#allocation5 + $0x124] ss:$12 sps:$4 sm:$0xff]  }
  0x39   :  { %v2568_v52 = vld [vmem:[%s3155_s3 + $0x40] sm:$0xff]   ;;  %v2581_v56 = vld [vmem:[#allocation5 + $0x170] ss:$12 sps:$4 sm:$0xff]   ;;  %v2586_v60 = vld [vmem:[#allocation5 + $0x248] ss:$12 sps:$4 sm:$0xff]  }
  0x3a   :  { %v2570_v53 = vld [vmem:[#allocation5 + $0x120] ss:$12 sps:$4 sm:$0xff]   ;;  %v2577_v55 = vld [vmem:[#allocation5 + $0x98] ss:$12 sps:$4 sm:$0xff]   ;;  %v2575_v57 = vld [vmem:[#allocation5 + $0x13c] ss:$12 sps:$4 sm:$0xff]  }
  0x3b   :  { %1281 = vmatpush1.bf16.msra.mxu0 %v2525_v15  ;;  %v2582_v58 = vld [vmem:[#allocation5 + $0xb0] ss:$12 sps:$4 sm:$0xff]   ;;  %v2573_v59 = vld [vmem:[#allocation5 + $0x138] ss:$12 sps:$4 sm:$0xff]   ;;  %v2580_v61 = vld [vmem:[#allocation5 + $0x154] ss:$12 sps:$4 sm:$0xff]  }
  0x3c   :  { %1282 = vmatprep.subr.bf16.mxu0 %v2530_v18  ;;  %v2578_v62 = vld [vmem:[#allocation5 + $0x150] ss:$12 sps:$4 sm:$0xff]   ;;  %v2585_v63 = vld [vmem:[#allocation5 + $0x16c] ss:$12 sps:$4 sm:$0xff]   ;;  %v2587_v10 = vld [vmem:[#allocation5 + $0x188] ss:$12 sps:$4 sm:$0xff]  }
  0x3d   :  { %2017 = vmatmul.mubr.msk.bf16.gmra.mrb[8].mxu0 %vm426_vm0, %v2523_v16  ;;  %2026 = vmatmul.mubr.msk.bf16.gmra.mrb[8].mxu1 %vm426_vm0, %v2829_v19  ;;  %v51_v1 = vld [vmem:[#allocation2 + $0x8] sm:$0xff]  ;;  %v2590_v6 = vld [vmem:[#allocation5 + $0x184] ss:$12 sps:$4 sm:$0xff]  }
  0x3e   :  { %525 = vmatprep.mubr.bf16.mxu0 %v2728_v0  ;;  %2326 = vmatprep.mubr.msk.bf16.mxu1 %vm426_vm0, %v2509_v3  ;;  %v55_v2 = vld [vmem:[#allocation2 + $0x28] sm:$0xff]  ;;  %v58_v14 = vld [vmem:[#allocation2 + $0x40] sm:$0xff] }
  0x3f   :  { %1283 = vmatpush1.bf16.msra.mxu0 %v2528_v20  ;;  %v2583_v3 = vld [vmem:[#allocation5 + $0x168] ss:$12 sps:$4 sm:$0xff]   ;;  %v147_v5 = vpack.c.bf16 %v55_v2, %v51_v1  ;;  %v62_v15 = vld [vmem:[#allocation2 + $0x60] sm:$0xff] }
  0x40   :  { %1284 = vmatprep.subr.bf16.mxu0 %v2536_v21  ;;  %v59_v7 = vld [vmem:[#allocation2 + $0x48] sm:$0xff]  ;;  %v2591_v17 = vld [vmem:[#allocation5 + $0x198] ss:$12 sps:$4 sm:$0xff]   ;;  %v2598_v21 = vld [vmem:[#allocation5 + $0x1b4] ss:$12 sps:$4 sm:$0xff]  }
  0x41   :  { %v2593_v13 = vld [vmem:[#allocation5 + $0x19c] ss:$12 sps:$4 sm:$0xff]   ;;  %v2595_v18 = vld [vmem:[#allocation5 + $0x1a0] ss:$12 sps:$4 sm:$0xff]  }
  0x42   :  { %v71_v20 = vld [vmem:[#allocation2 + $0xa8] sm:$0xff] }
  0x43   :  { %1285 = vmatpush1.bf16.msra.mxu0 %v2534_v22  ;;  %v2602_v22 = vld [vmem:[#allocation5 + $0x278] ss:$12 sps:$4 sm:$0xff]  }
  0x44   :  { %1286 = vmatprep.subr.bf16.mxu0 %v2540_v23  ;;  %v150_v23 = vpack.c.bf16 %v62_v15, %v58_v14  ;;  %v98_v14 = vld [vmem:[#allocation2 + $0x180] sm:$0xff] }
  0x45   :  { %2018 = vmatmul.mubr.msk.bf16.gmra.mrb[12].mxu0 %vm426_vm0, %v2531_v24  ;;  %2327 = vmatmul.mubr.msk.bf16.vlgmr.msra.gmra.mrb[12].mxu1 %vm426_vm0, %v2515_v8  ;;  %v63_v8 = vld [vmem:[#allocation2 + $0x68] sm:$0xff]  ;;  %v102_v15 = vld [vmem:[#allocation2 + $0x1a0] sm:$0xff] }
  0x46   :  { %2149 = vmatpush3.bf16.msra.mxu1 %v2533_v25  ;;  %535 = vmatprep.mubr.bf16.mxu0 %v2728_v0  ;;  %v151_v12 = vpack.c.bf16 %v63_v8, %v59_v7  ;;  %v2596_v25 = vld [vmem:[#allocation5 + $0x1b0] ss:$12 sps:$4 sm:$0xff]   ;;  %v103_v7 = vld [vmem:[#allocation2 + $0x1a8] sm:$0xff]  ;;  %v2623_v8 = vld [vmem:[#allocation5 + $0x258] ss:$12 sps:$4 sm:$0xff]  }
  0x47   :  { %2150 = vmatprep.subr.bf16.mxu1 %v2537_v26  ;;  %2330 = vmatprep.mubr.msk.bf16.mxu1 %vm426_vm0, %v2523_v16  ;;  %v2594_v16 = vld [vmem:[#allocation5 + $0x260] ss:$12 sps:$4 sm:$0xff]   ;;  %v2603_v26 = vld [vmem:[#allocation5 + $0x1b8] ss:$12 sps:$4 sm:$0xff]  }
  0x48   :  { %1287 = vmatpush1.bf16.msra.mxu0 %v2538_v27  ;;  %v66_v27 = vld [vmem:[#allocation2 + $0x80] sm:$0xff] }
  0x49   :  { %1288 = vmatprep.subr.bf16.mxu0 %v2545_v28  ;;  %v2601_v28 = vld [vmem:[#allocation5 + $0x1cc] ss:$12 sps:$4 sm:$0xff]  }
  0x4a   :  { %2151 = vmatpush3.bf16.msra.mxu1 %v2541_v29  ;;  %v2610_v29 = vld [vmem:[#allocation5 + $0x290] ss:$12 sps:$4 sm:$0xff]  }
  0x4b   :  { %2152 = vmatprep.subr.bf16.mxu1 %v2546_v30  ;;  %v70_v30 = vld [vmem:[#allocation2 + $0xa0] sm:$0xff] }
  0x4c   :  { %1289 = vmatpush1.bf16.msra.mxu0 %v2543_v31  ;;  %v2599_v31 = vld [vmem:[#allocation5 + $0x1c8] ss:$12 sps:$4 sm:$0xff]  }
  0x4d   :  { %2019 = vmatmul.mubr.msk.bf16.gmra.mrb[16].mxu0 %vm426_vm0, %v2542_v32  ;;  %2331 = vmatmul.mubr.msk.bf16.gmra.mrb[16].mxu1 %vm426_vm0, %v2531_v24 }
  0x4e   :  { %2153 = vmatpush3.bf16.msra.mxu1 %v2547_v33  ;;  %545 = vmatprep.mubr.bf16.mxu0 %v2728_v0  ;;  %v79_v33 = vld [vmem:[#allocation2 + $0xe8] sm:$0xff] }
  0x4f   :  { %2334 = vmatprep.mubr.msk.bf16.mxu1 %vm426_vm0, %v2542_v32  ;;  %1290 = vmatprep.subr.bf16.mxu0 %v2551_v35  ;;  %v75_v32 = vld [vmem:[#allocation2 + $0xc8] sm:$0xff]  ;;  %v2611_v35 = vld [vmem:[#allocation5 + $0x1d0] ss:$12 sps:$4 sm:$0xff]  }
  0x50   :  { %1291 = vmatpush1.bf16.msra.mxu0 %v2549_v34  ;;  %2154 = vmatprep.subr.bf16.mxu1 %v2552_v36  ;;  %v2606_v34 = vld [vmem:[#allocation5 + $0x1e4] ss:$12 sps:$4 sm:$0xff]   ;;  %v2618_v36 = vld [vmem:[#allocation5 + $0x2a8] ss:$12 sps:$4 sm:$0xff]  }
  0x51   :  { %1292 = vmatprep.subr.bf16.mxu0 %v2556_v37  ;;  %v154_v37 = vpack.c.bf16 %v70_v30, %v66_v27  ;;  %v119_v27 = vld [vmem:[#allocation2 + $0x228] sm:$0xff] }
  0x52   :  { %2155 = vmatpush3.bf16.msra.mxu1 %v2553_v38  ;;  %v159_v38 = vpack.c.bf16 %v79_v33, %v75_v32  ;;  %v2644_v32 = vld [vmem:[#allocation5 + $0x2d0] ss:$12 sps:$4 sm:$0xff]   ;;  %v2649_v33 = vld [vmem:[#allocation5 + $0x2ec] ss:$12 sps:$4 sm:$0xff]  }
  0x53   :  { %2156 = vmatprep.subr.bf16.mxu1 %v2562_v39  ;;  %v2604_v39 = vld [vmem:[#allocation5 + $0x1e0] ss:$12 sps:$4 sm:$0xff]  }
  0x54   :  { %1293 = vmatpush1.bf16.msra.mxu0 %v2554_v40  ;;  %v2609_v40 = vld [vmem:[#allocation5 + $0x1fc] ss:$12 sps:$4 sm:$0xff]  }
  0x55   :  { %2020 = vmatmul.mubr.msk.bf16.gmra.mrb[20].mxu0 %vm426_vm0, %v2548_v41  ;;  %2335 = vmatmul.mubr.msk.bf16.gmra.mrb[20].mxu1 %vm426_vm0, %v2548_v41  ;;  %v2619_v41 = vld [vmem:[#allocation5 + $0x1e8] ss:$12 sps:$4 sm:$0xff]  }
  0x56   :  { %555 = vmatprep.mubr.bf16.mxu0 %v2728_v0  ;;  %2338 = vmatprep.mubr.msk.bf16.mxu1 %vm426_vm0, %v2557_v42 }
  0x57   :  { %1294 = vmatprep.subr.bf16.mxu0 %v2561_v44  ;;  %2157 = vmatpush3.bf16.msra.mxu1 %v2563_v45  ;;  %v78_v44 = vld [vmem:[#allocation2 + $0xe0] sm:$0xff]  ;;  %v83_v45 = vld [vmem:[#allocation2 + $0x108] sm:$0xff] }
  0x58   :  { %1295 = vmatpush1.bf16.msra.mxu0 %v2559_v43  ;;  %2158 = vmatprep.subr.bf16.mxu1 %v2567_v46  ;;  %v2626_v43 = vld [vmem:[#allocation5 + $0x2c0] ss:$12 sps:$4 sm:$0xff]  }
  0x59   :  { %1296 = vmatprep.subr.bf16.mxu0 %v2566_v47  ;;  %v87_v46 = vld [vmem:[#allocation2 + $0x128] sm:$0xff]  ;;  %v2607_v47 = vld [vmem:[#allocation5 + $0x1f8] ss:$12 sps:$4 sm:$0xff]  }
  0x5b   :  { %2159 = vmatpush3.bf16.msra.mxu1 %v2569_v49  ;;  %v2614_v49 = vld [vmem:[#allocation5 + $0x214] ss:$12 sps:$4 sm:$0xff]  }
  0x5c   :  { %1297 = vmatpush1.bf16.msra.mxu0 %v2564_v48  ;;  %2160 = vmatprep.subr.bf16.mxu1 %v2576_v50  ;;  %v2627_v48 = vld [vmem:[#allocation5 + $0x200] ss:$12 sps:$4 sm:$0xff]   ;;  %v2634_v50 = vld [vmem:[#allocation5 + $0x2d8] ss:$12 sps:$4 sm:$0xff]  }
  0x5d   :  { %2021 = vmatmul.mubr.msk.bf16.gmra.mrb[24].mxu0 %vm426_vm0, %v2557_v42  ;;  %2339 = vmatmul.mubr.msk.bf16.gmra.mrb[24].mxu1 %vm426_vm0, %v2558_v51  ;;  %v74_v42 = vld [vmem:[#allocation2 + $0xc0] sm:$0xff] }
  0x5e   :  { %565 = vmatprep.mubr.bf16.mxu0 %v2728_v0  ;;  %2342 = vmatprep.mubr.msk.bf16.mxu1 %vm426_vm0, %v2568_v52 }
  0x5f   :  { %1298 = vmatprep.subr.bf16.mxu0 %v2572_v54  ;;  %2161 = vmatpush3.bf16.msra.mxu1 %v2577_v55  ;;  %v2635_v54 = vld [vmem:[#allocation5 + $0x218] ss:$12 sps:$4 sm:$0xff]  }
  0x60   :  { %1299 = vmatpush1.bf16.msra.mxu0 %v2570_v53  ;;  %2162 = vmatprep.subr.bf16.mxu1 %v2581_v56  ;;  %v2612_v53 = vld [vmem:[#allocation5 + $0x210] ss:$12 sps:$4 sm:$0xff]   ;;  %v82_v55 = vld [vmem:[#allocation2 + $0x100] sm:$0xff]  ;;  %v2617_v56 = vld [vmem:[#allocation5 + $0x22c] ss:$12 sps:$4 sm:$0xff]  }
  0x61   :  { %1300 = vmatprep.subr.bf16.mxu0 %v2575_v57  ;;  %v2642_v57 = vld [vmem:[#allocation5 + $0x2f0] ss:$12 sps:$4 sm:$0xff]  }
  0x63   :  { %2163 = vmatpush3.bf16.msra.mxu1 %v2582_v58  ;;  %v86_v58 = vld [vmem:[#allocation2 + $0x120] sm:$0xff] }
  0x64   :  { %1301 = vmatpush1.bf16.msra.mxu0 %v2573_v59  ;;  %2236 = vmatprep.subr.bf16.mxu1 %v2586_v60  ;;  %v91_v59 = vld [vmem:[#allocation2 + $0x148] sm:$0xff]  ;;  %v162_v1 = vpack.c.bf16 %v86_v58, %v82_v55  ;;  %v53_v55 = vld [vmem:[#allocation2 + $0x18] sm:$0xff] }
  0x65   :  { %2022 = vmatmul.mubr.msk.bf16.gmra.mrb[28].mxu0 %vm426_vm0, %v2558_v51  ;;  %2343 = vmatmul.mubr.msk.bf16.gmra.mrb[28].mxu1 %vm426_vm0, %v2800_v4  ;;  %v50_v4 = vld [vmem:[#allocation2] sm:$0xff]  ;;  %v158_v51 = vpack.c.bf16 %v78_v44, %v74_v42  ;;  %v95_v60 = vld [vmem:[#allocation2 + $0x168] sm:$0xff] }
  0x66   :  { %575 = vmatprep.mubr.bf16.mxu0 %v2728_v0  ;;  %2346 = vmatprep.mubr.msk.bf16.mxu1 %vm426_vm0, %v2816_v11  ;;  %v54_v0 = vld [vmem:[#allocation2 + $0x20] sm:$0xff]  ;;  %v167_v2 = vpack.c.bf16 %v95_v60, %v91_v59  ;;  %v135_v44 = vld [vmem:[#allocation2 + $0x2a8] sm:$0xff]  ;;  %v52_v59 = vld [vmem:[#allocation2 + $0x10] sm:$0xff] }
  0x67   :  { %1302 = vmatprep.subr.bf16.mxu0 %v2580_v61  ;;  %v146_v9 = vpack.c.bf16 %v54_v0, %v50_v4  ;;  %v2588_v11 = vld [vmem:[#allocation5 + $0x180] ss:$12 sps:$4 sm:$0xff]   ;;  %v2615_v61 = vld [vmem:[#allocation5 + $0x228] ss:$12 sps:$4 sm:$0xff]  }
  0x68   :  { %1303 = vmatpush1.bf16.msra.mxu0 %v2578_v62  ;;  %v2643_v62 = vld [vmem:[#allocation5 + $0x230] ss:$12 sps:$4 sm:$0xff]   ;;  %v94_v4 = vld [vmem:[#allocation2 + $0x160] sm:$0xff]  ;;  %v99_v0 = vld [vmem:[#allocation2 + $0x188] sm:$0xff] }
  0x69   :  { %1304 = vmatprep.subr.bf16.mxu0 %v2585_v63  ;;  %v2622_v63 = vld [vmem:[#allocation5 + $0x244] ss:$12 sps:$4 sm:$0xff]  }
  0x6a   :  { %v126_v42 = vld [vmem:[#allocation2 + $0x260] sm:$0xff]  ;;  %v56_v60 = vld [vmem:[#allocation2 + $0x30] sm:$0xff] }
  0x6c   :  { %1305 = vmatpush1.bf16.msra.mxu0 %v2583_v3  ;;  %v2620_v3 = vld [vmem:[#allocation5 + $0x240] ss:$12 sps:$4 sm:$0xff]  }
  0x6d   :  { %2023 = vmatmul.mubr.msk.bf16.gmra.mrb[32].mxu0 %vm426_vm0, %v2568_v52  ;;  %2347 = vmatmul.mubr.msk.bf16.gmra.mrb[32].mxu1 %vm426_vm0, %v2829_v19  ;;  %v67_v19 = vld [vmem:[#allocation2 + $0x88] sm:$0xff]  ;;  %v163_v52 = vpack.c.bf16 %v87_v46, %v83_v45 }
  0x6e   :  { %1306 = vmatprep.mubr.bf16.mxu0 %v147_v5  ;;  %1612 = vmatprep.mubr.bf16.mxu1 %v147_v5  ;;  %v155_v24 = vpack.c.bf16 %v71_v20, %v67_v19  ;;  %v2625_v5 = vld [vmem:[#allocation5 + $0x25c] ss:$12 sps:$4 sm:$0xff]   ;;  %v2638_v19 = vld [vmem:[#allocation5 + $0x2a4] ss:$12 sps:$4 sm:$0xff]   ;;  %v170_v20 = vpack.c.bf16 %v102_v15, %v98_v14 }
  0x6f   :  { %1427 = vmatprep.subr.bf16.mxu0 %v2590_v6  ;;  %v90_v6 = vld [vmem:[#allocation2 + $0x140] sm:$0xff]  ;;  %v80_v14 = vld [vmem:[#allocation2 + $0xf0] sm:$0xff]  ;;  %v85_v15 = vld [vmem:[#allocation2 + $0x118] sm:$0xff] }
  0x75   :  { %1307 = vmatmul.mubr.bf16.vlgmr.msra.gmra.mrb[0].mxu0 %v146_v9  ;;  %1613 = vmatmul.mubr.bf16.vlgmr.msra.gmra.mrb[36].mxu1 %v146_v9  ;;  %v2630_v9 = vld [vmem:[#allocation5 + $0x274] ss:$12 sps:$4 sm:$0xff]  }
  0x76   :  { %2237 = vmatpush3.bf16.msra.mxu1 %v2587_v10  ;;  %1428 = vmatpush1.bf16.msra.mxu0 %v2588_v11  ;;  %v166_v10 = vpack.c.bf16 %v94_v4, %v90_v6  ;;  %v171_v11 = vpack.c.bf16 %v103_v7, %v99_v0  ;;  %v73_v6 = vld [vmem:[#allocation2 + $0xb8] sm:$0xff]  ;;  %v68_v7 = vld [vmem:[#allocation2 + $0x90] sm:$0xff] }
  0x77   :  { %1316 = vmatprep.mubr.bf16.mxu0 %v151_v12  ;;  %1620 = vmatprep.mubr.bf16.mxu1 %v151_v12  ;;  %v2628_v12 = vld [vmem:[#allocation5 + $0x270] ss:$12 sps:$4 sm:$0xff]  }
  0x78   :  { %1429 = vmatprep.subr.bf16.mxu0 %v2593_v13  ;;  %2238 = vmatprep.subr.bf16.mxu1 %v2594_v16  ;;  %v2633_v13 = vld [vmem:[#allocation5 + $0x28c] ss:$12 sps:$4 sm:$0xff]  }
  0x79   :  { %v107_v16 = vld [vmem:[#allocation2 + $0x1c8] sm:$0xff] }
  0x7a   :  { %1430 = vmatpush1.bf16.msra.mxu0 %v2591_v17  ;;  %2239 = vmatpush3.bf16.msra.mxu1 %v2595_v18  ;;  %v111_v17 = vld [vmem:[#allocation2 + $0x1e8] sm:$0xff] }
  0x7b   :  { %1431 = vmatprep.subr.bf16.mxu0 %v2598_v21  ;;  %2240 = vmatprep.subr.bf16.mxu1 %v2602_v22  ;;  %v2631_v18 = vld [vmem:[#allocation5 + $0x288] ss:$12 sps:$4 sm:$0xff]   ;;  %v175_v21 = vpack.c.bf16 %v111_v17, %v107_v16  ;;  %v2636_v22 = vld [vmem:[#allocation5 + $0x2a0] ss:$12 sps:$4 sm:$0xff]   ;;  %v89_v16 = vld [vmem:[#allocation2 + $0x138] sm:$0xff] }
  0x7d   :  { %1317 = vmatmul.mubr.bf16.gmra.mrb[4].mxu0 %v150_v23  ;;  %1621 = vmatmul.mubr.bf16.gmra.mrb[40].mxu1 %v150_v23  ;;  %v2641_v23 = vld [vmem:[#allocation5 + $0x2bc] ss:$12 sps:$4 sm:$0xff]  }
  0x7e   :  { %1326 = vmatprep.mubr.bf16.mxu0 %v155_v24  ;;  %1628 = vmatprep.mubr.bf16.mxu1 %v155_v24  ;;  %v106_v24 = vld [vmem:[#allocation2 + $0x1c0] sm:$0xff] }
  0x7f   :  { %1432 = vmatpush1.bf16.msra.mxu0 %v2596_v25  ;;  %2241 = vmatpush3.bf16.msra.mxu1 %v2603_v26  ;;  %v110_v25 = vld [vmem:[#allocation2 + $0x1e0] sm:$0xff]  ;;  %v115_v26 = vld [vmem:[#allocation2 + $0x208] sm:$0xff] }
  0x80   :  { %1433 = vmatprep.subr.bf16.mxu0 %v2601_v28  ;;  %2242 = vmatprep.subr.bf16.mxu1 %v2610_v29  ;;  %v2639_v28 = vld [vmem:[#allocation5 + $0x2b8] ss:$12 sps:$4 sm:$0xff]   ;;  %v2646_v29 = vld [vmem:[#allocation5 + $0x2d4] ss:$12 sps:$4 sm:$0xff]   ;;  %v174_v30 = vpack.c.bf16 %v110_v25, %v106_v24 }
  0x81   :  { %v92_v25 = vld [vmem:[#allocation2 + $0x150] sm:$0xff] }
  0x83   :  { %1434 = vmatpush1.bf16.msra.mxu0 %v2599_v31  ;;  %2243 = vmatpush3.bf16.msra.mxu1 %v2611_v35  ;;  %v179_v31 = vpack.c.bf16 %v119_v27, %v115_v26  ;;  %v118_v35 = vld [vmem:[#allocation2 + $0x220] sm:$0xff]  ;;  %v96_v26 = vld [vmem:[#allocation2 + $0x170] sm:$0xff]  ;;  %v101_v27 = vld [vmem:[#allocation2 + $0x198] sm:$0xff] }
  0x84   :  { %1435 = vmatprep.subr.bf16.mxu0 %v2606_v34  ;;  %2244 = vmatprep.subr.bf16.mxu1 %v2618_v36  ;;  %v114_v34 = vld [vmem:[#allocation2 + $0x200] sm:$0xff]  ;;  %v123_v36 = vld [vmem:[#allocation2 + $0x248] sm:$0xff] }
  0x85   :  { %1327 = vmatmul.mubr.bf16.gmra.mrb[8].mxu0 %v154_v37  ;;  %1629 = vmatmul.mubr.bf16.gmra.mrb[44].mxu1 %v154_v37  ;;  %v127_v37 = vld [vmem:[#allocation2 + $0x268] sm:$0xff] }
  0x86   :  { %1336 = vmatprep.mubr.bf16.mxu0 %v159_v38  ;;  %1636 = vmatprep.mubr.bf16.mxu1 %v159_v38  ;;  %v2647_v38 = vld [vmem:[#allocation5 + $0x2e8] ss:$12 sps:$4 sm:$0xff]  }
  0x87   :  { %1436 = vmatpush1.bf16.msra.mxu0 %v2604_v39  ;;  %2245 = vmatpush3.bf16.msra.mxu1 %v2619_v41  ;;  %v178_v39 = vpack.c.bf16 %v118_v35, %v114_v34  ;;  %v122_v41 = vld [vmem:[#allocation2 + $0x240] sm:$0xff]  ;;  %v113_v34 = vld [vmem:[#allocation2 + $0x1f8] sm:$0xff] }
  0x88   :  { %1437 = vmatprep.subr.bf16.mxu0 %v2609_v40  ;;  %2246 = vmatprep.subr.bf16.mxu1 %v2626_v43  ;;  %v183_v40 = vpack.c.bf16 %v127_v37, %v123_v36  ;;  %v131_v43 = vld [vmem:[#allocation2 + $0x288] sm:$0xff]  ;;  %v182_v45 = vpack.c.bf16 %v126_v42, %v122_v41  ;;  %v108_v41 = vld [vmem:[#allocation2 + $0x1d0] sm:$0xff] }
  0x89   :  { %v187_v46 = vpack.c.bf16 %v135_v44, %v131_v43  ;;  %v112_v42 = vld [vmem:[#allocation2 + $0x1f0] sm:$0xff]  ;;  %v117_v43 = vld [vmem:[#allocation2 + $0x218] sm:$0xff] }
  0x8a   :  { %v121_v44 = vld [vmem:[#allocation2 + $0x238] sm:$0xff] }
  0x8b   :  { %1438 = vmatpush1.bf16.msra.mxu0 %v2607_v47  ;;  %2247 = vmatpush3.bf16.msra.mxu1 %v2627_v48  ;;  %v130_v47 = vld [vmem:[#allocation2 + $0x280] sm:$0xff] }
  0x8c   :  { %1439 = vmatprep.subr.bf16.mxu0 %v2614_v49  ;;  %2248 = vmatprep.subr.bf16.mxu1 %v2634_v50  ;;  %v134_v48 = vld [vmem:[#allocation2 + $0x2a0] sm:$0xff]  ;;  %v139_v49 = vld [vmem:[#allocation2 + $0x2c8] sm:$0xff] }
  0x8d   :  { %1337 = vmatmul.mubr.bf16.gmra.mrb[12].mxu0 %v158_v51  ;;  %1637 = vmatmul.mubr.bf16.gmra.mrb[48].mxu1 %v158_v51  ;;  %v143_v50 = vld [vmem:[#allocation2 + $0x2e8] sm:$0xff]  ;;  %v186_v51 = vpack.c.bf16 %v134_v48, %v130_v47  ;;  %v176_v47 = vpack.c.bf16 %v112_v42, %v108_v41 }
  0x8e   :  { %1346 = vmatprep.mubr.bf16.mxu0 %v163_v52  ;;  %1644 = vmatprep.mubr.bf16.mxu1 %v163_v52  ;;  %v191_v52 = vpack.c.bf16 %v143_v50, %v139_v49  ;;  %v181_v49 = vpack.c.bf16 %v121_v44, %v117_v43 }
  0x8f   :  { %1440 = vmatpush1.bf16.msra.mxu0 %v2612_v53  ;;  %2249 = vmatpush3.bf16.msra.mxu1 %v2635_v54  ;;  %v138_v53 = vld [vmem:[#allocation2 + $0x2c0] sm:$0xff] }
  0x90   :  { %1441 = vmatprep.subr.bf16.mxu0 %v2617_v56  ;;  %2250 = vmatprep.subr.bf16.mxu1 %v2642_v57  ;;  %v142_v54 = vld [vmem:[#allocation2 + $0x2e0] sm:$0xff]  ;;  %v57_v56 = vld [vmem:[#allocation2 + $0x38] sm:$0xff] }
  0x91   :  { %v190_v57 = vpack.c.bf16 %v142_v54, %v138_v53  ;;  %v149_v58 = vpack.c.bf16 %v57_v56, %v53_v55  ;;  %v125_v53 = vld [vmem:[#allocation2 + $0x258] sm:$0xff] }
  0x92   :  { %v129_v54 = vld [vmem:[#allocation2 + $0x278] sm:$0xff] }
  0x93   :  { %1442 = vmatpush1.bf16.msra.mxu0 %v2615_v61  ;;  %2251 = vmatpush3.bf16.msra.mxu1 %v2643_v62  ;;  %v61_v61 = vld [vmem:[#allocation2 + $0x58] sm:$0xff] }
  0x94   :  { %1443 = vmatprep.subr.bf16.mxu0 %v2622_v63  ;;  %v65_v62 = vld [vmem:[#allocation2 + $0x78] sm:$0xff]  ;;  %v148_v63 = vpack.c.bf16 %v56_v60, %v52_v59  ;;  %v185_v59 = vpack.c.bf16 %v129_v54, %v125_v53 }
  0x95   :  { %1347 = vmatmul.mubr.bf16.gmra.mrb[16].mxu0 %v162_v1  ;;  %1645 = vmatmul.mubr.bf16.gmra.mrb[52].mxu1 %v162_v1  ;;  %v153_v1 = vpack.c.bf16 %v65_v62, %v61_v61  ;;  %v124_v61 = vld [vmem:[#allocation2 + $0x250] sm:$0xff] }
  0x96   :  { %1356 = vmatprep.mubr.bf16.mxu0 %v167_v2  ;;  %1652 = vmatprep.mubr.bf16.mxu1 %v167_v2  ;;  %v60_v2 = vld [vmem:[#allocation2 + $0x50] sm:$0xff] }
  0x97   :  { %1444 = vmatpush1.bf16.msra.mxu0 %v2620_v3  ;;  %v64_v3 = vld [vmem:[#allocation2 + $0x70] sm:$0xff] }
  0x98   :  { %1445 = vmatprep.subr.bf16.mxu0 %v2625_v5  ;;  %v69_v5 = vld [vmem:[#allocation2 + $0x98] sm:$0xff]  ;;  %v152_v4 = vpack.c.bf16 %v64_v3, %v60_v2  ;;  %v128_v62 = vld [vmem:[#allocation2 + $0x270] sm:$0xff] }
  0x99   :  { %v157_v0 = vpack.c.bf16 %v73_v6, %v69_v5  ;;  %v184_v5 = vpack.c.bf16 %v128_v62, %v124_v61 }
  0x9b   :  { %1446 = vmatpush1.bf16.msra.mxu0 %v2623_v8  ;;  %v72_v8 = vld [vmem:[#allocation2 + $0xb0] sm:$0xff] }
  0x9c   :  { %1447 = vmatprep.subr.bf16.mxu0 %v2630_v9  ;;  %v77_v9 = vld [vmem:[#allocation2 + $0xd8] sm:$0xff] }
  0x9d   :  { %1357 = vmatmul.mubr.bf16.gmra.mrb[20].mxu0 %v166_v10  ;;  %1653 = vmatmul.mubr.bf16.gmra.mrb[56].mxu1 %v166_v10  ;;  %v81_v10 = vld [vmem:[#allocation2 + $0xf8] sm:$0xff] }
  0x9e   :  { %1366 = vmatprep.mubr.bf16.mxu0 %v171_v11  ;;  %1660 = vmatprep.mubr.bf16.mxu1 %v171_v11  ;;  %v156_v11 = vpack.c.bf16 %v72_v8, %v68_v7  ;;  %v132_v7 = vld [vmem:[#allocation2 + $0x290] sm:$0xff] }
  0x9f   :  { %1448 = vmatpush1.bf16.msra.mxu0 %v2628_v12  ;;  %v161_v12 = vpack.c.bf16 %v81_v10, %v77_v9  ;;  %v136_v8 = vld [vmem:[#allocation2 + $0x2b0] sm:$0xff]  ;;  %v141_v9 = vld [vmem:[#allocation2 + $0x2d8] sm:$0xff] }
  0xa0   :  { %1449 = vmatprep.subr.bf16.mxu0 %v2633_v13  ;;  %v76_v13 = vld [vmem:[#allocation2 + $0xd0] sm:$0xff]  ;;  %v145_v10 = vld [vmem:[#allocation2 + $0x2f8] sm:$0xff] }
  0xa1   :  { %v160_v17 = vpack.c.bf16 %v80_v14, %v76_v13  ;;  %v188_v13 = vpack.c.bf16 %v136_v8, %v132_v7 }
  0xa3   :  { %1450 = vmatpush1.bf16.msra.mxu0 %v2631_v18  ;;  %v165_v18 = vpack.c.bf16 %v89_v16, %v85_v15  ;;  %v193_v15 = vpack.c.bf16 %v145_v10, %v141_v9 }
  0xa4   :  { %1451 = vmatprep.subr.bf16.mxu0 %v2638_v19  ;;  %v84_v19 = vld [vmem:[#allocation2 + $0x110] sm:$0xff] }
  0xa5   :  { %1367 = vmatmul.mubr.bf16.gmra.mrb[24].mxu0 %v170_v20  ;;  %1661 = vmatmul.mubr.bf16.gmra.mrb[60].mxu1 %v170_v20  ;;  %v88_v20 = vld [vmem:[#allocation2 + $0x130] sm:$0xff] }
  0xa6   :  { %1376 = vmatprep.mubr.bf16.mxu0 %v175_v21  ;;  %1668 = vmatprep.mubr.bf16.mxu1 %v175_v21  ;;  %v93_v21 = vld [vmem:[#allocation2 + $0x158] sm:$0xff] }
  0xa7   :  { %1452 = vmatpush1.bf16.msra.mxu0 %v2636_v22  ;;  %v97_v22 = vld [vmem:[#allocation2 + $0x178] sm:$0xff] }
  0xa8   :  { %1453 = vmatprep.subr.bf16.mxu0 %v2641_v23  ;;  %v164_v23 = vpack.c.bf16 %v88_v20, %v84_v19  ;;  %v169_v24 = vpack.c.bf16 %v97_v22, %v93_v21 }
  0xab   :  { %1454 = vmatpush1.bf16.msra.mxu0 %v2639_v28  ;;  %v105_v28 = vld [vmem:[#allocation2 + $0x1b8] sm:$0xff] }
  0xac   :  { %1455 = vmatprep.subr.bf16.mxu0 %v2646_v29  ;;  %v168_v29 = vpack.c.bf16 %v96_v26, %v92_v25 }
  0xad   :  { %1377 = vmatmul.mubr.bf16.gmra.mrb[28].mxu0 %v174_v30  ;;  %1669 = vmatmul.mubr.bf16.gmra.mrb[64].mxu1 %v174_v30  ;;  %v173_v30 = vpack.c.bf16 %v105_v28, %v101_v27 }
  0xae   :  { %1386 = vmatprep.mubr.bf16.mxu0 %v179_v31  ;;  %1676 = vmatprep.mubr.bf16.mxu1 %v179_v31  ;;  %v100_v31 = vld [vmem:[#allocation2 + $0x190] sm:$0xff] }
  0xaf   :  { %1456 = vmatpush1.bf16.msra.mxu0 %v2644_v32  ;;  %v104_v32 = vld [vmem:[#allocation2 + $0x1b0] sm:$0xff] }
  0xb0   :  { %1457 = vmatprep.subr.bf16.mxu0 %v2649_v33  ;;  %v109_v33 = vld [vmem:[#allocation2 + $0x1d8] sm:$0xff]  ;;  %v172_v37 = vpack.c.bf16 %v104_v32, %v100_v31 }
  0xb3   :  { %1458 = vmatpush1.bf16.msra.mxu0 %v2647_v38 }
  0xb5   :  { %1387 = vmatmul.mubr.bf16.gmra.mrb[32].mxu0 %v178_v39  ;;  %1677 = vmatmul.mubr.bf16.gmra.mrb[68].mxu1 %v178_v39  ;;  %v177_v39 = vpack.c.bf16 %v113_v34, %v109_v33 }
  0xb6   :  { %1396 = vmatprep.mubr.bf16.mxu0 %v183_v40  ;;  %1684 = vmatprep.mubr.bf16.mxu1 %v183_v40 }
  0xbd   :  { %1397 = vmatmul.mubr.bf16.gmra.mrb[36].mxu0 %v182_v45  ;;  %1685 = vmatmul.mubr.bf16.gmra.mrb[72].mxu1 %v182_v45 }
  0xbe   :  { %1406 = vmatprep.mubr.bf16.mxu0 %v187_v46  ;;  %1692 = vmatprep.mubr.bf16.mxu1 %v187_v46 }
  0xc5   :  { %1407 = vmatmul.mubr.bf16.gmra.mrb[40].mxu0 %v186_v51  ;;  %1693 = vmatmul.mubr.bf16.gmra.mrb[76].mxu1 %v186_v51  ;;  %v116_v51 = vld [vmem:[#allocation2 + $0x210] sm:$0xff] }
  0xc6   :  { %1416 = vmatprep.mubr.bf16.mxu0 %v191_v52  ;;  %1700 = vmatprep.mubr.bf16.mxu1 %v191_v52  ;;  %v120_v52 = vld [vmem:[#allocation2 + $0x230] sm:$0xff] }
  0xcd   :  { %1417 = vmatmul.mubr.bf16.gmra.mrb[44].mxu0 %v190_v57  ;;  %1701 = vmatmul.mubr.bf16.gmra.mrb[80].mxu1 %v190_v57  ;;  %v180_v57 = vpack.c.bf16 %v120_v52, %v116_v51 }
  0xce   :  { %1459 = vmatprep.mubr.bf16.mxu0 %v149_v58  ;;  %1741 = vmatprep.mubr.bf16.mxu1 %v149_v58 }
  0xd5   :  { %1460 = vmatmul.mubr.bf16.vlgmr.msra.gmra.mrb[0].mxu0 %v148_v63  ;;  %1742 = vmatmul.mubr.bf16.vlgmr.msra.gmra.mrb[84].mxu1 %v148_v63  ;;  %v133_v63 = vld [vmem:[#allocation2 + $0x298] sm:$0xff] }
  0xd6   :  { %1469 = vmatprep.mubr.bf16.mxu0 %v153_v1  ;;  %1749 = vmatprep.mubr.bf16.mxu1 %v153_v1  ;;  %v137_v1 = vld [vmem:[#allocation2 + $0x2b8] sm:$0xff] }
  0xdd   :  { %1470 = vmatmul.mubr.bf16.gmra.mrb[4].mxu0 %v152_v4  ;;  %1750 = vmatmul.mubr.bf16.gmra.mrb[88].mxu1 %v152_v4  ;;  %v189_v4 = vpack.c.bf16 %v137_v1, %v133_v63 }
  0xde   :  { %1479 = vmatprep.mubr.bf16.mxu0 %v157_v0  ;;  %1757 = vmatprep.mubr.bf16.mxu1 %v157_v0 }
  0xe5   :  { %1480 = vmatmul.mubr.bf16.gmra.mrb[8].mxu0 %v156_v11  ;;  %1758 = vmatmul.mubr.bf16.gmra.mrb[92].mxu1 %v156_v11 }
  0xe6   :  { %1489 = vmatprep.mubr.bf16.mxu0 %v161_v12  ;;  %1765 = vmatprep.mubr.bf16.mxu1 %v161_v12 }
  0xed   :  { %1490 = vmatmul.mubr.bf16.gmra.mrb[12].mxu0 %v160_v17  ;;  %1766 = vmatmul.mubr.bf16.gmra.mrb[96].mxu1 %v160_v17  ;;  %v140_v17 = vld [vmem:[#allocation2 + $0x2d0] sm:$0xff] }
  0xee   :  { %1499 = vmatprep.mubr.bf16.mxu0 %v165_v18  ;;  %1773 = vmatprep.mubr.bf16.mxu1 %v165_v18  ;;  %v144_v18 = vld [vmem:[#allocation2 + $0x2f0] sm:$0xff] }
  0xef   :  { %v192_v21 = vpack.c.bf16 %v144_v18, %v140_v17 }
  0xf5   :  { %1500 = vmatmul.mubr.bf16.gmra.mrb[16].mxu0 %v164_v23  ;;  %1774 = vmatmul.mubr.bf16.gmra.mrb[100].mxu1 %v164_v23 }
  0xf6   :  { %1509 = vmatprep.mubr.bf16.mxu0 %v169_v24  ;;  %1781 = vmatprep.mubr.bf16.mxu1 %v169_v24 }
  0xfd   :  { %1510 = vmatmul.mubr.bf16.gmra.mrb[20].mxu0 %v168_v29  ;;  %1782 = vmatmul.mubr.bf16.gmra.mrb[104].mxu1 %v168_v29 }
  0xfe   :  { %1519 = vmatprep.mubr.bf16.mxu0 %v173_v30  ;;  %1789 = vmatprep.mubr.bf16.mxu1 %v173_v30 }
 0x100   :  { %v2879_v35 = vpop.f32.mrb[0].mxu1 }
 0x101   :  { %v2881_v36 = vpop.f32.mrb[1].mxu1 }
 0x102   :  { %v2883_v38 = vpop.f32.mrb[2].mxu1 }
 0x103   :  { %v2885_v40 = vpop.f32.mrb[3].mxu1 }
 0x105   :  { %1520 = vmatmul.mubr.bf16.gmra.mrb[24].mxu0 %v172_v37  ;;  %1790 = vmatmul.mubr.bf16.gmra.mrb[108].mxu1 %v172_v37 }
 0x106   :  { %1529 = vmatprep.mubr.bf16.mxu0 %v177_v39  ;;  %1797 = vmatprep.mubr.bf16.mxu1 %v177_v39 }
 0x108   :  { %v2887_v45 = vpop.f32.mrb[4].mxu1 }
 0x109   :  { %3158 = vst [vmem:[#allocation11_spill] sm:$0xff] %v2887_v45  ;;  %v2889_v46 = vpop.f32.mrb[5].mxu1 }
 0x10a   :  { %3159 = vst [vmem:[#allocation12_spill] sm:$0xff] %v2889_v46  ;;  %v2891_v48 = vpop.f32.mrb[6].mxu1 }
 0x10b   :  { %3160 = vst [vmem:[#allocation13_spill] sm:$0xff] %v2891_v48  ;;  %v2893_v50 = vpop.f32.mrb[7].mxu1 }
 0x10c   :  { %3161 = vst [vmem:[#allocation14_spill] sm:$0xff] %v2893_v50 }
 0x10d   :  { %1530 = vmatmul.mubr.bf16.gmra.mrb[28].mxu0 %v176_v47  ;;  %1798 = vmatmul.mubr.bf16.gmra.mrb[112].mxu1 %v176_v47 }
 0x10e   :  { %1539 = vmatprep.mubr.bf16.mxu0 %v181_v49  ;;  %1805 = vmatprep.mubr.bf16.mxu1 %v181_v49 }
 0x110   :  { %v2895_v55 = vpop.f32.mrb[8].mxu1 }
 0x111   :  { %3162 = vst [vmem:[#allocation15_spill] sm:$0xff] %v2895_v55  ;;  %v2897_v56 = vpop.f32.mrb[9].mxu1 }
 0x112   :  { %3163 = vst [vmem:[#allocation16_spill] sm:$0xff] %v2897_v56  ;;  %v2899_v58 = vpop.f32.mrb[10].mxu1 }
 0x113   :  { %3164 = vst [vmem:[#allocation17_spill] sm:$0xff] %v2899_v58  ;;  %v2901_v60 = vpop.f32.mrb[11].mxu1 }
 0x114   :  { %3165 = vst [vmem:[#allocation18_spill] sm:$0xff] %v2901_v60 }
 0x115   :  { %1540 = vmatmul.mubr.bf16.gmra.mrb[32].mxu0 %v180_v57  ;;  %1806 = vmatmul.mubr.bf16.gmra.mrb[116].mxu1 %v180_v57 }
 0x116   :  { %1549 = vmatprep.mubr.bf16.mxu0 %v185_v59  ;;  %1813 = vmatprep.mubr.bf16.mxu1 %v185_v59 }
 0x118   :  { %v2903_v2 = vpop.f32.mrb[12].mxu1 }
 0x119   :  { %v2905_v3 = vpop.f32.mrb[13].mxu1 }
 0x11a   :  { %v2907_v6 = vpop.f32.mrb[14].mxu1 }
 0x11b   :  { %v2909_v0 = vpop.f32.mrb[15].mxu1 }
 0x11d   :  { %1550 = vmatmul.mubr.bf16.gmra.mrb[36].mxu0 %v184_v5  ;;  %1814 = vmatmul.mubr.bf16.gmra.mrb[120].mxu1 %v184_v5 }
 0x11e   :  { %1559 = vmatprep.mubr.bf16.mxu0 %v189_v4  ;;  %1821 = vmatprep.mubr.bf16.mxu1 %v189_v4 }
 0x120   :  { %v2911_v11 = vpop.f32.mrb[16].mxu1 }
 0x121   :  { %v2913_v12 = vpop.f32.mrb[17].mxu1 }
 0x122   :  { %v2915_v14 = vpop.f32.mrb[18].mxu1 }
 0x123   :  { %v2917_v16 = vpop.f32.mrb[19].mxu1 }
 0x125   :  { %1560 = vmatmul.mubr.bf16.gmra.mrb[40].mxu0 %v188_v13  ;;  %1822 = vmatmul.mubr.bf16.gmra.mrb[124].mxu1 %v188_v13 }
 0x126   :  { %1569 = vmatprep.mubr.bf16.mxu0 %v193_v15  ;;  %1829 = vmatprep.mubr.bf16.mxu1 %v193_v15 }
 0x128   :  { %v2919_v19 = vpop.f32.mrb[20].mxu1 }
 0x129   :  { %v2921_v20 = vpop.f32.mrb[21].mxu1 }
 0x12a   :  { %v2923_v22 = vpop.f32.mrb[22].mxu1 }
 0x12b   :  { %v2925_v23 = vpop.f32.mrb[23].mxu1 }
 0x12d   :  { %1570 = vmatmul.mubr.bf16.gmra.mrb[44].mxu0 %v192_v21  ;;  %1830 = vmatmul.mubr.bf16.gmra.mrb[128].mxu1 %v192_v21 }
 0x130   :  { %v2927_v24 = vpop.f32.mrb[24].mxu1 }
 0x131   :  { %v2929_v25 = vpop.f32.mrb[25].mxu1 }
 0x132   :  { %v2931_v26 = vpop.f32.mrb[26].mxu1 }
 0x133   :  { %v2933_v27 = vpop.f32.mrb[27].mxu1 }
 0x138   :  { %v2935_v28 = vpop.f32.mrb[28].mxu1 }
 0x139   :  { %v2937_v29 = vpop.f32.mrb[29].mxu1 }
 0x13a   :  { %v2939_v30 = vpop.f32.mrb[30].mxu1 }
 0x13b   :  { %3166 = vst [vmem:[#allocation19_spill] sm:$0xff] %v2939_v30  ;;  %v2941_v31 = vpop.f32.mrb[31].mxu1 }
 0x140   :  { %v2943_v32 = vpop.f32.mrb[32].mxu1 }
 0x141   :  { %3167 = vst [vmem:[#allocation20_spill] sm:$0xff] %v2943_v32  ;;  %v2945_v33 = vpop.f32.mrb[33].mxu1 }
 0x142   :  { %3168 = vst [vmem:[#allocation21_spill] sm:$0xff] %v2945_v33  ;;  %v2947_v34 = vpop.f32.mrb[34].mxu1 }
 0x143   :  { %3169 = vst [vmem:[#allocation22_spill] sm:$0xff] %v2947_v34  ;;  %v2949_v37 = vpop.f32.mrb[35].mxu1 }
 0x144   :  { %3170 = vst [vmem:[#allocation23_spill] sm:$0xff] %v2949_v37  ;;  %v747_v37 = vlaneseq }
 0x146   :  { %v748_v56 = vshrl.u32 %v747_v37, 7 }
 0x148   :  { %v2164_v39 = vpop.f32.mrb[36].mxu1  ;;  %v757_v55 = vsub.s32 2, %v748_v56 }
 0x149   :  { %v2165_v41 = vpop.f32.mrb[37].mxu1 }
 0x14a   :  { %v2951_v42 = vadd.f32 %v2165_v41, %v2164_v39  ;;  %v2167_v43 = vpop.f32.mrb[38].mxu1 }
 0x14b   :  { %v2168_v44 = vpop.f32.mrb[39].mxu1 }
 0x14c   :  { %v2953_v47 = vadd.f32 %v2168_v44, %v2167_v43 }
 0x150   :  { %v2170_v49 = vpop.f32.mrb[40].mxu1 }
 0x151   :  { %v2171_v51 = vpop.f32.mrb[41].mxu1 }
 0x152   :  { %v2955_v52 = vadd.f32 %v2171_v51, %v2170_v49  ;;  %v2173_v53 = vpop.f32.mrb[42].mxu1 }
 0x153   :  { %v2174_v54 = vpop.f32.mrb[43].mxu1 }
 0x154   :  { %v2957_v57 = vadd.f32 %v2174_v54, %v2173_v53 }
 0x158   :  { %v2176_v59 = vpop.f32.mrb[44].mxu1 }
 0x159   :  { %v2177_v61 = vpop.f32.mrb[45].mxu1 }
 0x15a   :  { %v2959_v62 = vadd.f32 %v2177_v61, %v2176_v59  ;;  %v2179_v63 = vpop.f32.mrb[46].mxu1 }
 0x15b   :  { %v2180_v1 = vpop.f32.mrb[47].mxu1 }
 0x15c   :  { %v2961_v5 = vadd.f32 %v2180_v1, %v2179_v63 }
 0x160   :  { %v2182_v4 = vpop.f32.mrb[48].mxu1 }
 0x161   :  { %v2183_v7 = vpop.f32.mrb[49].mxu1 }
 0x162   :  { %v2963_v8 = vadd.f32 %v2183_v7, %v2182_v4  ;;  %v2185_v9 = vpop.f32.mrb[50].mxu1 }
 0x163   :  { %v2186_v10 = vpop.f32.mrb[51].mxu1 }
 0x164   :  { %v2965_v13 = vadd.f32 %v2186_v10, %v2185_v9 }
 0x168   :  { %v2188_v15 = vpop.f32.mrb[52].mxu1 }
 0x169   :  { %v2189_v17 = vpop.f32.mrb[53].mxu1 }
 0x16a   :  { %v2967_v18 = vadd.f32 %v2189_v17, %v2188_v15  ;;  %v2191_v21 = vpop.f32.mrb[54].mxu1 }
 0x16b   :  { %v2192_v39 = vpop.f32.mrb[55].mxu1 }
 0x16c   :  { %v2969_v41 = vadd.f32 %v2192_v39, %v2191_v21 }
 0x170   :  { %v2194_v43 = vpop.f32.mrb[56].mxu1 }
 0x171   :  { %v2195_v44 = vpop.f32.mrb[57].mxu1 }
 0x172   :  { %v2971_v49 = vadd.f32 %v2195_v44, %v2194_v43  ;;  %v2197_v51 = vpop.f32.mrb[58].mxu1 }
 0x173   :  { %v2198_v53 = vpop.f32.mrb[59].mxu1 }
 0x174   :  { %v2973_v54 = vadd.f32 %v2198_v53, %v2197_v51 }
 0x178   :  { %v2200_v59 = vpop.f32.mrb[60].mxu1 }
 0x179   :  { %v2201_v61 = vpop.f32.mrb[61].mxu1 }
 0x17a   :  { %v2975_v63 = vadd.f32 %v2201_v61, %v2200_v59  ;;  %v2203_v1 = vpop.f32.mrb[62].mxu1 }
 0x17b   :  { %v2204_v4 = vpop.f32.mrb[63].mxu1 }
 0x17c   :  { %v2977_v7 = vadd.f32 %v2204_v4, %v2203_v1 }
 0x180   :  { %v2206_v9 = vpop.f32.mrb[64].mxu1 }
 0x181   :  { %v2207_v10 = vpop.f32.mrb[65].mxu1 }
 0x182   :  { %v2979_v15 = vadd.f32 %v2207_v10, %v2206_v9  ;;  %v2209_v17 = vpop.f32.mrb[66].mxu1 }
 0x183   :  { %v2210_v21 = vpop.f32.mrb[67].mxu1 }
 0x184   :  { %v2981_v39 = vadd.f32 %v2210_v21, %v2209_v17 }
 0x188   :  { %v2212_v43 = vpop.f32.mrb[68].mxu1 }
 0x189   :  { %v2213_v44 = vpop.f32.mrb[69].mxu1 }
 0x18a   :  { %v2983_v51 = vadd.f32 %v2213_v44, %v2212_v43  ;;  %v2215_v53 = vpop.f32.mrb[70].mxu1 }
 0x18b   :  { %v2216_v34 = vpop.f32.mrb[71].mxu1 }
 0x18c   :  { %v2985_v59 = vadd.f32 %v2216_v34, %v2215_v53 }
 0x190   :  { %v2218_v61 = vpop.f32.mrb[72].mxu1 }
 0x191   :  { %v2219_v32 = vpop.f32.mrb[73].mxu1 }
 0x192   :  { %v2987_v1 = vadd.f32 %v2219_v32, %v2218_v61  ;;  %v2221_v4 = vpop.f32.mrb[74].mxu1  ;;  %v749_v61 = vsub.s32 0, %v748_v56 }
 0x193   :  { %v2222_v60 = vpop.f32.mrb[75].mxu1 }
 0x194   :  { %v2989_v9 = vadd.f32 %v2222_v60, %v2221_v4  ;;  %v745_v60 = vld [vmem:[%s3154_s2] sm:$0x7]  ;;  %s2729_s2 = smov [#allocation7]  }
 0x195   :  { %s1987_s23 = sshll.u32 %s2729_s2, 4  ;;  %s1988_s23 = int_to_ptr.vmem [resolvable:$true] %s1987_s23 }
 0x196   :  { %s2694_s1 = scalar_lea.vmem %s1988_s23, 9216  ;;  %p2699_p3 = scmp.lt.s32.totalorder %s1988_s23, %s1988_s23 }
 0x197   :  { %p2695_p2 = scmp.ne.s32.totalorder %s1988_s23, %s2694_s1  ;;  %p2700_p4 = scmp.lt.s32.totalorder %s2694_s1, %s2694_s1 }
 0x198   :  { %v2224_v10 = vpop.f32.mrb[76].mxu1 }
 0x199   :  { %v2225_v58 = vpop.f32.mrb[77].mxu1  ;;  %p2701_p5 = por %p2700_p4, %p2699_p3 }
 0x19a   :  { %v2991_v17 = vadd.f32 %v2225_v58, %v2224_v10  ;;  %v2227_v21 = vpop.f32.mrb[78].mxu1  ;;  %v753_v58 = vsub.s32 1, %v748_v56  ;;  %v3002_v10 = vrot.slane %v745_v60, %v757_v55 }
 0x19b   :  { %v2228_v43 = vpop.f32.mrb[79].mxu1  ;;  %p2702_p6 = pnand %p2701_p5, %p2695_p2 }
 0x19c   :  { %3171 = vst [vmem:[#allocation24_spill] sm:$0xff] %v2991_v17  ;;  %v2993_v44 = vadd.f32 %v2228_v43, %v2227_v21  ;;  %v3004_v21 = vrot.slane %v745_v60, %v749_v61  ;;  %v3006_v37 = vrot.slane %v745_v60, %v753_v58  ;;  %v1615_v17 = vadd.f32 %v2951_v42, %v3002_v10 }
 0x19d   :  { %v1618_v58 = vadd.f32 %v2953_v47, %v3002_v10 }
 0x19e   :  { %3172 = vst [vmem:[#allocation25_spill] sm:$0xff] %v2993_v44 }
 0x1a0   :  { %v2230_v34 = vpop.f32.mrb[80].mxu1 }
 0x1a1   :  { %v2231_v53 = vpop.f32.mrb[81].mxu1 }
 0x1a2   :  { %v2995_v33 = vadd.f32 %v2231_v53, %v2230_v34  ;;  %v2233_v32 = vpop.f32.mrb[82].mxu1 }
 0x1a3   :  { %v2234_v50 = vpop.f32.mrb[83].mxu1 }
 0x1a4   :  { %3173 = vst [vmem:[#allocation26_spill] sm:$0xff] %v2995_v33  ;;  %v3000_v4 = vadd.f32 %v2234_v50, %v2233_v32 }
 0x1a6   :  { %3174 = vst [vmem:[#allocation27_spill] sm:$0xff] %v3000_v4 }
 0x1a8   :  { %v1461_v43 = vpop.f32.mrb[0].mxu0  ;;  %v2252_v44 = vpop.f32.mrb[84].mxu1 }
 0x1a9   :  { %v2352_v34 = vadd.f32 %v1461_v43, %v3004_v21  ;;  %v1463_v53 = vpop.f32.mrb[1].mxu0  ;;  %v2253_v33 = vpop.f32.mrb[85].mxu1 }
 0x1aa   :  { %v2353_v48 = vadd.f32 %v1463_v53, %v3006_v37  ;;  %v2254_v56 = vadd.f32 %v2253_v33, %v2252_v44  ;;  %v1465_v50 = vpop.f32.mrb[2].mxu0  ;;  %v2255_v32 = vpop.f32.mrb[86].mxu1 }
 0x1ab   :  { %1910 = vst [vmem:[#allocation7] sm:$0xff] %v2352_v34  ;;  %v2354_v55 = vadd.f32 %v1465_v50, %v3004_v21  ;;  %v1467_v61 = vpop.f32.mrb[3].mxu0  ;;  %v2256_v60 = vpop.f32.mrb[87].mxu1 }
 0x1ac   :  { %1911 = vst [vmem:[#allocation7 + $0x8] sm:$0xff] %v2353_v48  ;;  %v1744_v43 = vadd.f32 %v2254_v56, %v1615_v17  ;;  %v2355_v4 = vadd.f32 %v1467_v61, %v3006_v37  ;;  %v2257_v30 = vadd.f32 %v2256_v60, %v2255_v32  ;;  %v1623_v48 = vadd.f32 %v2955_v52, %v3002_v10 }
 0x1ad   :  { %1913 = vst [vmem:[#allocation7 + $0x18] sm:$0xff] %v2354_v55  ;;  %v1626_v32 = vadd.f32 %v2957_v57, %v3002_v10  ;;  %v1631_v57 = vadd.f32 %v2959_v62, %v3002_v10 }
 0x1ae   :  { %v1840_v42 = vadd.f32 %v1744_v43, %v2905_v3  ;;  %1914 = vst [vmem:[#allocation7 + $0x20] sm:$0xff] %v2355_v4  ;;  %v1747_v33 = vadd.f32 %v2257_v30, %v1618_v58 }
 0x1b0   :  { %1912 = vst [vmem:[#allocation7 + $0x10] sm:$0xff] %v1840_v42  ;;  %v1843_v44 = vadd.f32 %v1747_v33, %v2909_v0  ;;  %v1471_v34 = vpop.f32.mrb[4].mxu0  ;;  %v2258_v53 = vpop.f32.mrb[88].mxu1 }
 0x1b1   :  { %v2356_v50 = vadd.f32 %v1471_v34, %v3004_v21  ;;  %v1473_v46 = vpop.f32.mrb[5].mxu0  ;;  %v2259_v45 = vpop.f32.mrb[89].mxu1 }
 0x1b2   :  { %1915 = vst [vmem:[#allocation7 + $0x28] sm:$0xff] %v1843_v44  ;;  %v2357_v47 = vadd.f32 %v1473_v46, %v3006_v37  ;;  %v2260_v17 = vadd.f32 %v2259_v45, %v2258_v53  ;;  %v1475_v56 = vpop.f32.mrb[6].mxu0  ;;  %v2261_v3 = vpop.f32.mrb[90].mxu1 }
 0x1b3   :  { %1916 = vst [vmem:[#allocation7 + $0x30] sm:$0xff] %v2356_v50  ;;  %v2358_v30 = vadd.f32 %v1475_v56, %v3004_v21  ;;  %v1477_v4 = vpop.f32.mrb[7].mxu0  ;;  %v2262_v0 = vpop.f32.mrb[91].mxu1 }
 0x1b4   :  { %1917 = vst [vmem:[#allocation7 + $0x38] sm:$0xff] %v2357_v47  ;;  %v1752_v55 = vadd.f32 %v2260_v17, %v1623_v48  ;;  %v2359_v61 = vadd.f32 %v1477_v4, %v3006_v37  ;;  %v2263_v60 = vadd.f32 %v2262_v0, %v2261_v3  ;;  %v1634_v17 = vadd.f32 %v2961_v5, %v3002_v10 }
 0x1b5   :  { %1919 = vst [vmem:[#allocation7 + $0x48] sm:$0xff] %v2358_v30  ;;  %v1639_v5 = vadd.f32 %v2963_v8, %v3002_v10 }
 0x1b6   :  { %v1846_v52 = vadd.f32 %v2903_v2, %v1752_v55  ;;  %1920 = vst [vmem:[#allocation7 + $0x50] sm:$0xff] %v2359_v61  ;;  %v1755_v45 = vadd.f32 %v2263_v60, %v1626_v32 }
 0x1b8   :  { %1918 = vst [vmem:[#allocation7 + $0x40] sm:$0xff] %v1846_v52  ;;  %v1849_v46 = vadd.f32 %v2907_v6, %v1755_v45  ;;  %v1481_v58 = vpop.f32.mrb[8].mxu0  ;;  %v2264_v43 = vpop.f32.mrb[92].mxu1 }
 0x1b9   :  { %v2360_v42 = vadd.f32 %v1481_v58, %v3004_v21  ;;  %v1483_v33 = vpop.f32.mrb[9].mxu0  ;;  %v2265_v44 = vpop.f32.mrb[93].mxu1 }
 0x1ba   :  { %1921 = vst [vmem:[#allocation7 + $0x58] sm:$0xff] %v1849_v46  ;;  %v2361_v34 = vadd.f32 %v1483_v33, %v3006_v37  ;;  %v2266_v53 = vadd.f32 %v2265_v44, %v2264_v43  ;;  %v1485_v50 = vpop.f32.mrb[10].mxu0  ;;  %v2267_v2 = vpop.f32.mrb[94].mxu1  ;;  %v1642_v33 = vadd.f32 %v2965_v13, %v3002_v10  ;;  %v1647_v13 = vadd.f32 %v2967_v18, %v3002_v10 }
 0x1bb   :  { %1922 = vst [vmem:[#allocation7 + $0x60] sm:$0xff] %v2360_v42  ;;  %v2362_v48 = vadd.f32 %v1485_v50, %v3004_v21  ;;  %v1487_v47 = vpop.f32.mrb[11].mxu0  ;;  %v2268_v6 = vpop.f32.mrb[95].mxu1 }
 0x1bc   :  { %1923 = vst [vmem:[#allocation7 + $0x68] sm:$0xff] %v2361_v34  ;;  %v1760_v56 = vadd.f32 %v2266_v53, %v1631_v57  ;;  %v2363_v3 = vadd.f32 %v1487_v47, %v3006_v37  ;;  %v2269_v30 = vadd.f32 %v2268_v6, %v2267_v2 }
 0x1bd   :  { %1925 = vst [vmem:[#allocation7 + $0x78] sm:$0xff] %v2362_v48 }
 0x1be   :  { %v1852_v62 = vadd.f32 %v1760_v56, %v2913_v12  ;;  %1926 = vst [vmem:[#allocation7 + $0x80] sm:$0xff] %v2363_v3  ;;  %v1763_v4 = vadd.f32 %v2269_v30, %v1634_v17 }
 0x1c0   :  { %1924 = vst [vmem:[#allocation7 + $0x70] sm:$0xff] %v1852_v62  ;;  %v1855_v0 = vadd.f32 %v1763_v4, %v2917_v16  ;;  %v1491_v32 = vpop.f32.mrb[12].mxu0  ;;  %v2270_v55 = vpop.f32.mrb[96].mxu1 }
 0x1c1   :  { %v2364_v61 = vadd.f32 %v1491_v32, %v3004_v21  ;;  %v1493_v60 = vpop.f32.mrb[13].mxu0  ;;  %v2271_v52 = vpop.f32.mrb[97].mxu1 }
 0x1c2   :  { %1927 = vst [vmem:[#allocation7 + $0x88] sm:$0xff] %v1855_v0  ;;  %v2365_v45 = vadd.f32 %v1493_v60, %v3006_v37  ;;  %v2272_v46 = vadd.f32 %v2271_v52, %v2270_v55  ;;  %v1495_v58 = vpop.f32.mrb[14].mxu0  ;;  %v2273_v12 = vpop.f32.mrb[98].mxu1  ;;  %v1650_v0 = vadd.f32 %v2969_v41, %v3002_v10  ;;  %v1655_v41 = vadd.f32 %v2971_v49, %v3002_v10 }
 0x1c3   :  { %1928 = vst [vmem:[#allocation7 + $0x90] sm:$0xff] %v2364_v61  ;;  %v2366_v43 = vadd.f32 %v1495_v58, %v3004_v21  ;;  %v1497_v42 = vpop.f32.mrb[15].mxu0  ;;  %v2274_v16 = vpop.f32.mrb[99].mxu1 }
 0x1c4   :  { %1929 = vst [vmem:[#allocation7 + $0x98] sm:$0xff] %v2365_v45  ;;  %v1768_v44 = vadd.f32 %v2272_v46, %v1639_v5  ;;  %v2367_v57 = vadd.f32 %v1497_v42, %v3006_v37  ;;  %v2275_v34 = vadd.f32 %v2274_v16, %v2273_v12 }
 0x1c5   :  { %1931 = vst [vmem:[#allocation7 + $0xa8] sm:$0xff] %v2366_v43 }
 0x1c6   :  { %v1858_v8 = vadd.f32 %v2911_v11, %v1768_v44  ;;  %1932 = vst [vmem:[#allocation7 + $0xb0] sm:$0xff] %v2367_v57  ;;  %v1771_v53 = vadd.f32 %v2275_v34, %v1642_v33  ;;  %v1658_v57 = vadd.f32 %v2973_v54, %v3002_v10  ;;  %v1663_v54 = vadd.f32 %v2975_v63, %v3002_v10 }
 0x1c8   :  { %1930 = vst [vmem:[#allocation7 + $0xa0] sm:$0xff] %v1858_v8  ;;  %v1861_v50 = vadd.f32 %v2915_v14, %v1771_v53  ;;  %v1501_v2 = vpop.f32.mrb[16].mxu0  ;;  %v2276_v48 = vpop.f32.mrb[100].mxu1 }
 0x1c9   :  { %v2368_v47 = vadd.f32 %v1501_v2, %v3004_v21  ;;  %v1503_v6 = vpop.f32.mrb[17].mxu0  ;;  %v2277_v17 = vpop.f32.mrb[101].mxu1 }
 0x1ca   :  { %1933 = vst [vmem:[#allocation7 + $0xb8] sm:$0xff] %v1861_v50  ;;  %v2369_v56 = vadd.f32 %v1503_v6, %v3006_v37  ;;  %v2278_v3 = vadd.f32 %v2277_v17, %v2276_v48  ;;  %v1505_v30 = vpop.f32.mrb[18].mxu0  ;;  %v2279_v11 = vpop.f32.mrb[102].mxu1 }
 0x1cb   :  { %1934 = vst [vmem:[#allocation7 + $0xc0] sm:$0xff] %v2368_v47  ;;  %v2370_v62 = vadd.f32 %v1505_v30, %v3004_v21  ;;  %v1507_v4 = vpop.f32.mrb[19].mxu0  ;;  %v2280_v14 = vpop.f32.mrb[103].mxu1 }
 0x1cc   :  { %1935 = vst [vmem:[#allocation7 + $0xc8] sm:$0xff] %v2369_v56  ;;  %v1776_v32 = vadd.f32 %v2278_v3, %v1647_v13  ;;  %v2371_v55 = vadd.f32 %v1507_v4, %v3006_v37  ;;  %v2281_v61 = vadd.f32 %v2280_v14, %v2279_v11  ;;  %v1666_v4 = vadd.f32 %v2977_v7, %v3002_v10 }
 0x1cd   :  { %1937 = vst [vmem:[#allocation7 + $0xd8] sm:$0xff] %v2370_v62  ;;  %v1671_v7 = vadd.f32 %v2979_v15, %v3002_v10 }
 0x1ce   :  { %v1864_v18 = vadd.f32 %v1776_v32, %v2921_v20  ;;  %1938 = vst [vmem:[#allocation7 + $0xe0] sm:$0xff] %v2371_v55  ;;  %v1779_v60 = vadd.f32 %v2281_v61, %v1650_v0 }
 0x1d0   :  { %1936 = vst [vmem:[#allocation7 + $0xd0] sm:$0xff] %v1864_v18  ;;  %v1867_v52 = vadd.f32 %v1779_v60, %v2925_v23  ;;  %v1511_v5 = vpop.f32.mrb[20].mxu0  ;;  %v2282_v45 = vpop.f32.mrb[104].mxu1 }
 0x1d1   :  { %v2372_v46 = vadd.f32 %v1511_v5, %v3004_v21  ;;  %v1513_v58 = vpop.f32.mrb[21].mxu0  ;;  %v2283_v12 = vpop.f32.mrb[105].mxu1 }
 0x1d2   :  { %1939 = vst [vmem:[#allocation7 + $0xe8] sm:$0xff] %v1867_v52  ;;  %v2373_v43 = vadd.f32 %v1513_v58, %v3006_v37  ;;  %v2284_v42 = vadd.f32 %v2283_v12, %v2282_v45  ;;  %v1515_v16 = vpop.f32.mrb[22].mxu0  ;;  %v2285_v20 = vpop.f32.mrb[106].mxu1 }
 0x1d3   :  { %1940 = vst [vmem:[#allocation7 + $0xf0] sm:$0xff] %v2372_v46  ;;  %v2374_v33 = vadd.f32 %v1515_v16, %v3004_v21  ;;  %v1517_v44 = vpop.f32.mrb[23].mxu0  ;;  %v2286_v23 = vpop.f32.mrb[107].mxu1 }
 0x1d4   :  { %1941 = vst [vmem:[#allocation7 + $0xf8] sm:$0xff] %v2373_v43  ;;  %v1784_v34 = vadd.f32 %v2284_v42, %v1655_v41  ;;  %v2375_v8 = vadd.f32 %v1517_v44, %v3006_v37  ;;  %v2287_v53 = vadd.f32 %v2286_v23, %v2285_v20  ;;  %v1674_v42 = vadd.f32 %v2981_v39, %v3002_v10 }
 0x1d5   :  { %1943 = vst [vmem:[#allocation7 + $0x108] sm:$0xff] %v2374_v33  ;;  %v1679_v39 = vadd.f32 %v2983_v51, %v3002_v10 }
 0x1d6   :  { %v1870_v49 = vadd.f32 %v2919_v19, %v1784_v34  ;;  %1944 = vst [vmem:[#allocation7 + $0x110] sm:$0xff] %v2375_v8  ;;  %v1787_v50 = vadd.f32 %v2287_v53, %v1658_v57 }
 0x1d8   :  { %1942 = vst [vmem:[#allocation7 + $0x100] sm:$0xff] %v1870_v49  ;;  %v1873_v2 = vadd.f32 %v2923_v22, %v1787_v50  ;;  %v1521_v48 = vpop.f32.mrb[24].mxu0  ;;  %v2288_v47 = vpop.f32.mrb[108].mxu1 }
 0x1d9   :  { %v2376_v6 = vadd.f32 %v1521_v48, %v3004_v21  ;;  %v1523_v17 = vpop.f32.mrb[25].mxu0  ;;  %v2289_v13 = vpop.f32.mrb[109].mxu1 }
 0x1da   :  { %1945 = vst [vmem:[#allocation7 + $0x118] sm:$0xff] %v1873_v2  ;;  %v2377_v56 = vadd.f32 %v1523_v17, %v3006_v37  ;;  %v2290_v3 = vadd.f32 %v2289_v13, %v2288_v47  ;;  %v1525_v30 = vpop.f32.mrb[26].mxu0  ;;  %v2291_v19 = vpop.f32.mrb[110].mxu1  ;;  %v1682_v17 = vadd.f32 %v2985_v59, %v3002_v10 }
 0x1db   :  { %1946 = vst [vmem:[#allocation7 + $0x120] sm:$0xff] %v2376_v6  ;;  %v2378_v11 = vadd.f32 %v1525_v30, %v3004_v21  ;;  %v1527_v62 = vpop.f32.mrb[27].mxu0  ;;  %v2292_v22 = vpop.f32.mrb[111].mxu1  ;;  %v2388_v30 = vadd.f32 %v3004_v21, %v2879_v35  ;;  %v1687_v35 = vadd.f32 %v2987_v1, %v3002_v10 }
 0x1dc   :  { %1947 = vst [vmem:[#allocation7 + $0x128] sm:$0xff] %v2377_v56  ;;  %v1792_v14 = vadd.f32 %v2290_v3, %v1663_v54  ;;  %v2379_v0 = vadd.f32 %v1527_v62, %v3006_v37  ;;  %v2293_v32 = vadd.f32 %v2292_v22, %v2291_v19  ;;  %v2390_v19 = vadd.f32 %v3006_v37, %v2881_v36 }
 0x1dd   :  { %1949 = vst [vmem:[#allocation7 + $0x138] sm:$0xff] %v2378_v11  ;;  %v2392_v22 = vadd.f32 %v3004_v21, %v2883_v38  ;;  %v1690_v38 = vadd.f32 %v2989_v9, %v3002_v10 }
 0x1de   :  { %v1876_v63 = vadd.f32 %v1792_v14, %v2929_v25  ;;  %1950 = vst [vmem:[#allocation7 + $0x140] sm:$0xff] %v2379_v0  ;;  %v1795_v55 = vadd.f32 %v2293_v32, %v1666_v4 }
 0x1e0   :  { %1948 = vst [vmem:[#allocation7 + $0x130] sm:$0xff] %v1876_v63  ;;  %v1879_v61 = vadd.f32 %v1795_v55, %v2933_v27  ;;  %v1531_v18 = vpop.f32.mrb[28].mxu0  ;;  %v2294_v60 = vpop.f32.mrb[112].mxu1 }
 0x1e1   :  { %v2380_v52 = vadd.f32 %v1531_v18, %v3004_v21  ;;  %v1533_v5 = vpop.f32.mrb[29].mxu0  ;;  %v2295_v45 = vpop.f32.mrb[113].mxu1 }
 0x1e2   :  { %1951 = vst [vmem:[#allocation7 + $0x148] sm:$0xff] %v1879_v61  ;;  %v2381_v46 = vadd.f32 %v1533_v5, %v3006_v37  ;;  %v2296_v58 = vadd.f32 %v2295_v45, %v2294_v60  ;;  %v1535_v12 = vpop.f32.mrb[30].mxu0  ;;  %v2297_v25 = vpop.f32.mrb[114].mxu1  ;;  %v3175_v45 = vld [vmem:[#allocation11_spill] sm:$0xff] }
 0x1e3   :  { %1952 = vst [vmem:[#allocation7 + $0x150] sm:$0xff] %v2380_v52  ;;  %v2382_v41 = vadd.f32 %v1535_v12, %v3004_v21  ;;  %v1537_v43 = vpop.f32.mrb[31].mxu0  ;;  %v2298_v27 = vpop.f32.mrb[115].mxu1  ;;  %v3177_v12 = vld [vmem:[#allocation19_spill] sm:$0xff] }
 0x1e4   :  { %1953 = vst [vmem:[#allocation7 + $0x158] sm:$0xff] %v2381_v46  ;;  %v1800_v16 = vadd.f32 %v2296_v58, %v1671_v7  ;;  %v2383_v20 = vadd.f32 %v1537_v43, %v3006_v37  ;;  %v2299_v33 = vadd.f32 %v2298_v27, %v2297_v25  ;;  %v2396_v7 = vadd.f32 %v3004_v21, %v3175_v45  ;;  %v3176_v46 = vld [vmem:[#allocation12_spill] sm:$0xff]  ;;  %v3178_v43 = vld [vmem:[#allocation13_spill] sm:$0xff] }
 0x1e5   :  { %1955 = vst [vmem:[#allocation7 + $0x168] sm:$0xff] %v2382_v41  ;;  %v2398_v58 = vadd.f32 %v3006_v37, %v3176_v46  ;;  %v2400_v27 = vadd.f32 %v3004_v21, %v3178_v43 }
 0x1e6   :  { %v1882_v15 = vadd.f32 %v2927_v24, %v1800_v16  ;;  %1956 = vst [vmem:[#allocation7 + $0x170] sm:$0xff] %v2383_v20  ;;  %v1803_v44 = vadd.f32 %v2299_v33, %v1674_v42 }
 0x1e8   :  { %1954 = vst [vmem:[#allocation7 + $0x160] sm:$0xff] %v1882_v15  ;;  %v1885_v23 = vadd.f32 %v2931_v26, %v1803_v44  ;;  %v1541_v57 = vpop.f32.mrb[32].mxu0  ;;  %v2300_v34 = vpop.f32.mrb[116].mxu1  ;;  %v3180_v15 = vld [vmem:[#allocation24_spill] sm:$0xff] }
 0x1e9   :  { %v2384_v8 = vadd.f32 %v1541_v57, %v3004_v21  ;;  %v1543_v53 = vpop.f32.mrb[33].mxu0  ;;  %v2301_v49 = vpop.f32.mrb[117].mxu1  ;;  %v1695_v44 = vadd.f32 %v3180_v15, %v3002_v10 }
 0x1ea   :  { %1957 = vst [vmem:[#allocation7 + $0x178] sm:$0xff] %v1885_v23  ;;  %v2385_v50 = vadd.f32 %v1543_v53, %v3006_v37  ;;  %v2302_v2 = vadd.f32 %v2301_v49, %v2300_v34  ;;  %v1545_v48 = vpop.f32.mrb[34].mxu0  ;;  %v2303_v24 = vpop.f32.mrb[118].mxu1 }
 0x1eb   :  { %1958 = vst [vmem:[#allocation7 + $0x180] sm:$0xff] %v2384_v8  ;;  %v2386_v47 = vadd.f32 %v1545_v48, %v3004_v21  ;;  %v1547_v6 = vpop.f32.mrb[35].mxu0  ;;  %v2304_v26 = vpop.f32.mrb[119].mxu1 }
 0x1ec   :  { %1959 = vst [vmem:[#allocation7 + $0x188] sm:$0xff] %v2385_v50  ;;  %v1808_v13 = vadd.f32 %v2302_v2, %v1679_v39  ;;  %v2387_v54 = vadd.f32 %v1547_v6, %v3006_v37  ;;  %v2305_v56 = vadd.f32 %v2304_v26, %v2303_v24  ;;  %v3181_v50 = vld [vmem:[#allocation25_spill] sm:$0xff] }
 0x1ed   :  { %1961 = vst [vmem:[#allocation7 + $0x198] sm:$0xff] %v2386_v47  ;;  %v1698_v2 = vadd.f32 %v3181_v50, %v3002_v10  ;;  %v3182_v6 = vld [vmem:[#allocation21_spill] sm:$0xff] }
 0x1ee   :  { %v1888_v51 = vadd.f32 %v1808_v13, %v2937_v29  ;;  %1962 = vst [vmem:[#allocation7 + $0x1a0] sm:$0xff] %v2387_v54  ;;  %v1811_v3 = vadd.f32 %v2305_v56, %v1682_v17  ;;  %v2394_v29 = vadd.f32 %v3006_v37, %v2885_v40  ;;  %v3183_v13 = vld [vmem:[#allocation15_spill] sm:$0xff]  ;;  %v3184_v56 = vld [vmem:[#allocation16_spill] sm:$0xff] }
 0x1ef   :  { %v2404_v54 = vadd.f32 %v3004_v21, %v3183_v13 }
 0x1f0   :  { %1960 = vst [vmem:[#allocation7 + $0x190] sm:$0xff] %v1888_v51  ;;  %v1891_v11 = vadd.f32 %v1811_v3, %v2941_v31  ;;  %v1551_v59 = vpop.f32.mrb[36].mxu0  ;;  %v2306_v62 = vpop.f32.mrb[120].mxu1  ;;  %v2406_v51 = vadd.f32 %v3006_v37, %v3184_v56  ;;  %v3185_v3 = vld [vmem:[#allocation23_spill] sm:$0xff] }
 0x1f1   :  { %v2389_v4 = vadd.f32 %v2388_v30, %v1551_v59  ;;  %v1553_v14 = vpop.f32.mrb[37].mxu0  ;;  %v2307_v0 = vpop.f32.mrb[121].mxu1  ;;  %v3186_v59 = vld [vmem:[#allocation17_spill] sm:$0xff] }
 0x1f2   :  { %1963 = vst [vmem:[#allocation7 + $0x1a8] sm:$0xff] %v1891_v11  ;;  %v2391_v32 = vadd.f32 %v2390_v19, %v1553_v14  ;;  %v2308_v36 = vadd.f32 %v2307_v0, %v2306_v62  ;;  %v1555_v63 = vpop.f32.mrb[38].mxu0  ;;  %v2309_v55 = vpop.f32.mrb[122].mxu1  ;;  %v2408_v62 = vadd.f32 %v3004_v21, %v3186_v59  ;;  %v3187_v0 = vld [vmem:[#allocation18_spill] sm:$0xff]  ;;  %v3189_v21 = vld [vmem:[#allocation27_spill] sm:$0xff] }
 0x1f3   :  { %1964 = vst [vmem:[#allocation7 + $0x1b0] sm:$0xff] %v2389_v4  ;;  %v2393_v31 = vadd.f32 %v2392_v22, %v1555_v63  ;;  %v1557_v61 = vpop.f32.mrb[39].mxu0  ;;  %v2310_v18 = vpop.f32.mrb[123].mxu1 }
 0x1f4   :  { %1965 = vst [vmem:[#allocation7 + $0x1b8] sm:$0xff] %v2391_v32  ;;  %v1816_v60 = vadd.f32 %v2308_v36, %v1687_v35  ;;  %v2395_v52 = vadd.f32 %v2394_v29, %v1557_v61  ;;  %v2311_v5 = vadd.f32 %v2310_v18, %v2309_v55  ;;  %v2410_v29 = vadd.f32 %v3006_v37, %v3187_v0  ;;  %v3188_v35 = vld [vmem:[#allocation26_spill] sm:$0xff] }
 0x1f5   :  { %1967 = vst [vmem:[#allocation7 + $0x1c8] sm:$0xff] %v2393_v31  ;;  %v1703_v32 = vadd.f32 %v3188_v35, %v3002_v10 }
 0x1f6   :  { %v1894_v40 = vadd.f32 %v2935_v28, %v1816_v60  ;;  %1968 = vst [vmem:[#allocation7 + $0x1d0] sm:$0xff] %v2395_v52  ;;  %v1819_v1 = vadd.f32 %v2311_v5, %v1690_v38  ;;  %v3179_v28 = vld [vmem:[#allocation14_spill] sm:$0xff]  ;;  %v1706_v60 = vadd.f32 %v3189_v21, %v3002_v10 }
 0x1f7   :  { %v2402_v33 = vadd.f32 %v3006_v37, %v3179_v28  ;;  %v3190_v37 = vld [vmem:[#allocation20_spill] sm:$0xff] }
 0x1f8   :  { %1966 = vst [vmem:[#allocation7 + $0x1c0] sm:$0xff] %v1894_v40  ;;  %v1897_v25 = vadd.f32 %v3177_v12, %v1819_v1  ;;  %v1561_v41 = vpop.f32.mrb[40].mxu0  ;;  %v2312_v9 = vpop.f32.mrb[124].mxu1 }
 0x1f9   :  { %v2397_v42 = vadd.f32 %v2396_v7, %v1561_v41  ;;  %v1563_v16 = vpop.f32.mrb[41].mxu0  ;;  %v2313_v20 = vpop.f32.mrb[125].mxu1  ;;  %v3191_v7 = vld [vmem:[#allocation22_spill] sm:$0xff] }
 0x1fa   :  { %1969 = vst [vmem:[#allocation7 + $0x1d8] sm:$0xff] %v1897_v25  ;;  %v2399_v23 = vadd.f32 %v2398_v58, %v1563_v16  ;;  %v2314_v57 = vadd.f32 %v2313_v20, %v2312_v9  ;;  %v1565_v34 = vpop.f32.mrb[42].mxu0  ;;  %v2315_v8 = vpop.f32.mrb[126].mxu1 }
 0x1fb   :  { %1970 = vst [vmem:[#allocation7 + $0x1e0] sm:$0xff] %v2397_v42  ;;  %v2401_v53 = vadd.f32 %v2400_v27, %v1565_v34  ;;  %v1567_v49 = vpop.f32.mrb[43].mxu0  ;;  %v2316_v39 = vpop.f32.mrb[127].mxu1 }
 0x1fc   :  { %1971 = vst [vmem:[#allocation7 + $0x1e8] sm:$0xff] %v2399_v23  ;;  %v1824_v48 = vadd.f32 %v2314_v57, %v1695_v44  ;;  %v2403_v24 = vadd.f32 %v2402_v33, %v1567_v49  ;;  %v2317_v47 = vadd.f32 %v2316_v39, %v2315_v8 }
 0x1fd   :  { %1973 = vst [vmem:[#allocation7 + $0x1f8] sm:$0xff] %v2401_v53 }
 0x1fe   :  { %v1900_v26 = vadd.f32 %v1824_v48, %v3182_v6  ;;  %1974 = vst [vmem:[#allocation7 + $0x200] sm:$0xff] %v2403_v24  ;;  %v1827_v17 = vadd.f32 %v2317_v47, %v1698_v2 }
 0x200   :  { %1972 = vst [vmem:[#allocation7 + $0x1f0] sm:$0xff] %v1900_v26  ;;  %v1903_v30 = vadd.f32 %v1827_v17, %v3185_v3  ;;  %v1571_v19 = vpop.f32.mrb[44].mxu0  ;;  %v2318_v11 = vpop.f32.mrb[128].mxu1 }
 0x201   :  { %v2405_v22 = vadd.f32 %v2404_v54, %v1571_v19  ;;  %v1573_v4 = vpop.f32.mrb[45].mxu0  ;;  %v2319_v14 = vpop.f32.mrb[129].mxu1 }
 0x202   :  { %1975 = vst [vmem:[#allocation7 + $0x208] sm:$0xff] %v1903_v30  ;;  %v2407_v36 = vadd.f32 %v2406_v51, %v1573_v4  ;;  %v2320_v63 = vadd.f32 %v2319_v14, %v2318_v11  ;;  %v1575_v55 = vpop.f32.mrb[46].mxu0  ;;  %v2321_v31 = vpop.f32.mrb[130].mxu1 }
 0x203   :  { %1976 = vst [vmem:[#allocation7 + $0x210] sm:$0xff] %v2405_v22  ;;  %v2409_v61 = vadd.f32 %v2408_v62, %v1575_v55  ;;  %v1577_v18 = vpop.f32.mrb[47].mxu0  ;;  %v2322_v38 = vpop.f32.mrb[131].mxu1 }
 0x204   :  { %1977 = vst [vmem:[#allocation7 + $0x218] sm:$0xff] %v2407_v36  ;;  %v1832_v52 = vadd.f32 %v2320_v63, %v1703_v32  ;;  %v2411_v5 = vadd.f32 %v2410_v29, %v1577_v18  ;;  %v2323_v40 = vadd.f32 %v2322_v38, %v2321_v31 }
 0x205   :  { %1979 = vst [vmem:[#allocation7 + $0x228] sm:$0xff] %v2409_v61 }
 0x206   :  { %v1906_v1 = vadd.f32 %v3190_v37, %v1832_v52  ;;  %1980 = vst [vmem:[#allocation7 + $0x230] sm:$0xff] %v2411_v5  ;;  %v1835_v45 = vadd.f32 %v2323_v40, %v1706_v60 }
 0x208   :  { %1978 = vst [vmem:[#allocation7 + $0x220] sm:$0xff] %v1906_v1  ;;  %v1909_v46 = vadd.f32 %v3191_v7, %v1835_v45 }
 0x20a   :  { %1981 = vst [vmem:[#allocation7 + $0x238] sm:$0xff] %v1909_v46 }
 0x20b   :  { %2705 = shalt.err (!%p2702_p6)
}
 0x20c   :  { %s2706_s26 = scalar_lea.hbm %s3157_s5, 9216 }
 0x20d   :  { %p2707_p7 = scmp.ne.s32.totalorder %s3157_s5, %s2706_s26  ;;  %p2710_p8 = scmp.lt.u32.totalorder %s2706_s26, %s3157_s5 }
 0x20f   :  { %p2712_p9 = pnand %p2710_p8, %p2707_p7 }
 0x211   :  { %2715 = shalt.err (!%p2712_p9)
}
 0x212   :  { %s2730_s4 = smov 384   ;;  %s2731_s6 = smov 24  }
 0x213   :  { %1993 = dma.vmem_to_hbm [thread:$0]  %s1988_s23, 9216, %s3157_s5, [#allocation4], %s2730_s4, %s2730_s4, %s2731_s6  }
 0x214   :  { %2720 = dma.done.wait [#allocation4], 9216  }
 0x215   :  { %2721 = vsyncadd [#allocation4], 4294958080 }
 0x216   :  { %1997 = vsyncpa [#allocation3], 1 }
 0x217   :  { %1998 = vsyncpa [#allocation6], 1 }
 0x218   :  { %1999 = vsyncpa [#allocation4], 1 }

</bundles_post_ra>
